<compile_context>
chip_gen: v6e
topology: v6e:2x2x1
jax: 0.10.0
libtpu: 0.0.40
codegen_flags: <defaults>
</compile_context>

<pallas_src>
import functools

import jax
import jax.numpy as jnp
from jax.experimental import pallas as pl
from jax.experimental.pallas import tpu as pltpu


# ----------------------------------------------------------------------------
# Kernels
# ----------------------------------------------------------------------------
def _deconv_stats_kernel(x_ref, w_ref, sum_ref, ssq_ref, *, m_total, tm, needs_mask):
    """Partial BN statistics of y = W_cols^T @ X for one M-chunk (layer 1).

    x_ref   : (Cin, tm)     chunk of channel-major pixels (lane axis = pixels)
    w_ref   : (ncol, Cin)   deconv weights, rows ordered (cout, kh, kw)
    sum_ref : (1, ncol, 1)  per-chunk partial sum
    ssq_ref : (1, ncol, 1)  per-chunk partial sum of squares
    """
    y = jnp.dot(w_ref[...], x_ref[...], preferred_element_type=jnp.float32)
    if needs_mask:
        # Tail chunk: zero padded (out-of-bounds) pixel columns so they do not
        # pollute the statistics (block padding content is unspecified).
        col = pl.program_id(0) * tm + jax.lax.broadcasted_iota(jnp.int32, y.shape, 1)
        y = jnp.where(col < m_total, y, 0.0)
    sum_ref[...] = jnp.sum(y, axis=1, keepdims=True)[None]
    ssq_ref[...] = jnp.sum(y * y, axis=1, keepdims=True)[None]


def _deconv_bn_relu_emit_stats_kernel(x_ref, w_ref, scale_ref, shift_ref,
                                      a_ref, sum_ref, gram_ref,
                                      *, m_total, tm, needs_mask):
    """Layer-1 apply (matmul + BN + ReLU), fused with layer-2 partial stats.

    a_ref    : (ncol1, tm)        activated output chunk (lane-dense store)
    sum_ref  : (1, ncol1, 1)      per-chunk row sums of the activation
    gram_ref : (1, ncol1, ncol1)  per-chunk Gram matrix A_chunk @ A_chunk^T
    The sums/Gram fold (exactly) into layer-2 pre-BN first/second moments at
    host level, so layer 2 needs no separate statistics pass over A1.
    """
    y = jnp.dot(w_ref[...], x_ref[...], preferred_element_type=jnp.float32)
    a = jnp.maximum(y * scale_ref[...] + shift_ref[...], 0.0)
    if needs_mask:
        col = pl.program_id(0) * tm + jax.lax.broadcasted_iota(jnp.int32, a.shape, 1)
        a = jnp.where(col < m_total, a, 0.0)
    a_ref[...] = a.astype(a_ref.dtype)
    sum_ref[...] = jnp.sum(a, axis=1, keepdims=True)[None]
    gram_ref[...] = jax.lax.dot_general(
        a, a, (((1,), (1,)), ((), ())),
        preferred_element_type=jnp.float32)[None]


def _deconv_bn_relu_kernel(x_ref, w_ref, scale_ref, shift_ref, o_ref):
    """Layer-2 apply: tiny-K matmul + fused BN + ReLU; lane-dense stores."""
    y = jnp.dot(w_ref[...], x_ref[...], preferred_element_type=jnp.float32)
    y = jnp.maximum(y * scale_ref[...] + shift_ref[...], 0.0)
    o_ref[...] = y.astype(o_ref.dtype)


# ----------------------------------------------------------------------------
# Helpers
# ----------------------------------------------------------------------------
def _choose_tile(m, tm):
    """Largest multiple of 128 that is <= tm and not wastefully larger than m."""
    m_ceil = ((m + 127) // 128) * 128
    return max(128, min((tm // 128) * 128, m_ceil))


def _bn_rows_from_col_moments(col_sum, col_ssq, gamma, beta, count, eps):
    """Per-(cout,kh,kw)-column first/second moments -> per-row BN scale/shift."""
    ncol = col_sum.shape[0]
    cout = ncol // 4
    sum_c = col_sum.reshape(cout, 4).sum(axis=1)             # fold (kh, kw)
    ssq_c = col_ssq.reshape(cout, 4).sum(axis=1)
    mean = sum_c / count
    var = jnp.maximum(ssq_c / count - mean * mean, 0.0)      # biased (train mode)
    scale_c = gamma.astype(jnp.float32) / jnp.sqrt(var + eps)
    shift_c = beta.astype(jnp.float32) - mean * scale_c
    scale_rows = jnp.repeat(scale_c, 4).reshape(ncol, 1)     # per (cout,kh,kw) row
    shift_rows = jnp.repeat(shift_c, 4).reshape(ncol, 1)
    return scale_rows, shift_rows


# ----------------------------------------------------------------------------
# Full module forward
# ----------------------------------------------------------------------------
def double_deconv2d_bn_forward(x_nchw, params, *, eps=1e-5, tm=2048,
                               intermediate_dtype=jnp.float32):
    """x_nchw: (N, Cin, H, W) -> (N, Cout2, 4H, 4W).

    `intermediate_dtype=jnp.bfloat16` halves the HBM traffic of the
    layer-1 -> layer-2 hand-off (in-kernel compute and BN stats stay f32)."""
    N, Cin, H, W = x_nchw.shape
    C1 = params["w1"].shape[1]
    C2 = params["w2"].shape[1]
    M1 = N * H * W
    M2 = 4 * M1
    ncol1, ncol2 = 4 * C1, 4 * C2

    cparams = pltpu.CompilerParams(
        dimension_semantics=("parallel",),
        vmem_limit_bytes=32 * 1024 * 1024,
    )

    # NCHW -> channel-major flat pixels (smallest tensor in the graph).
    x_t = jnp.transpose(x_nchw, (1, 0, 2, 3)).reshape(Cin, M1).astype(jnp.float32)

    # Columns of w.reshape(Cin, 4*Cout) are already (cout, kh, kw)-ordered.
    w1_t = jnp.transpose(params["w1"].reshape(Cin, ncol1)).astype(jnp.float32)
    w2_t = jnp.transpose(params["w2"].reshape(C1, ncol2)).astype(jnp.float32)

    # ---- layer 1, pass 1: per-chunk partial BN1 statistics ------------------
    tm1 = _choose_tile(M1, tm)
    n1 = pl.cdiv(M1, tm1)
    mask1 = (M1 % tm1) != 0
    part_sum1, part_ssq1 = pl.pallas_call(
        functools.partial(_deconv_stats_kernel, m_total=M1, tm=tm1,
                          needs_mask=mask1),
        out_shape=(
            jax.ShapeDtypeStruct((n1, ncol1, 1), jnp.float32),
            jax.ShapeDtypeStruct((n1, ncol1, 1), jnp.float32),
        ),
        grid_spec=pltpu.PrefetchScalarGridSpec(
            num_scalar_prefetch=0,
            grid=(n1,),
            in_specs=[
                pl.BlockSpec((Cin, tm1), lambda i: (0, i)),
                pl.BlockSpec((ncol1, Cin), lambda i: (0, 0)),
            ],
            out_specs=(
                pl.BlockSpec((1, ncol1, 1), lambda i: (i, 0, 0)),
                pl.BlockSpec((1, ncol1, 1), lambda i: (i, 0, 0)),
            ),
        ),
        compiler_params=cparams,
    )(x_t, w1_t)

    col_sum1 = jnp.sum(part_sum1[:, :, 0], axis=0)
    col_ssq1 = jnp.sum(part_ssq1[:, :, 0], axis=0)
    scale1, shift1 = _bn_rows_from_col_moments(
        col_sum1, col_ssq1, params["gamma1"], params["beta1"],
        float(4 * M1), eps)                                  # N*2H*2W samples

    # ---- layer 1, pass 2: apply (BN1 + ReLU) + emit layer-2 partial stats ---
    a1, part_sum2, part_gram2 = pl.pallas_call(
        functools.partial(_deconv_bn_relu_emit_stats_kernel,
                          m_total=M1, tm=tm1, needs_mask=mask1),
        out_shape=(
            jax.ShapeDtypeStruct((ncol1, M1), intermediate_dtype),
            jax.ShapeDtypeStruct((n1, ncol1, 1), jnp.float32),
            jax.ShapeDtypeStruct((n1, ncol1, ncol1), jnp.float32),
        ),
        grid_spec=pltpu.PrefetchScalarGridSpec(
            num_scalar_prefetch=0,
            grid=(n1,),
            in_specs=[
                pl.BlockSpec((Cin, tm1), lambda i: (0, i)),
                pl.BlockSpec((ncol1, Cin), lambda i: (0, 0)),
                pl.BlockSpec((ncol1, 1), lambda i: (0, 0)),
                pl.BlockSpec((ncol1, 1), lambda i: (0, 0)),
            ],
            out_specs=(
                pl.BlockSpec((ncol1, tm1), lambda i: (0, i)),
                pl.BlockSpec((1, ncol1, 1), lambda i: (i, 0, 0)),
                pl.BlockSpec((1, ncol1, ncol1), lambda i: (i, 0, 0)),
            ),
        ),
        compiler_params=cparams,
    )(x_t, w1_t, scale1, shift1)

    # ---- fold fused partials into layer-2 BN stats (no extra pass over a1) --
    # x2[c1, k*M1 + p] = a1[c1*4 + k, p]; y2 = w2_t @ x2.
    row_sum1 = jnp.sum(part_sum2[:, :, 0], axis=0)                 # (4*C1,)
    s2 = row_sum1.reshape(C1, 4).sum(axis=1)                       # sum_q x2[c1,q]
    gram_rows = jnp.sum(part_gram2, axis=0)                        # (4C1, 4C1)
    g2 = jnp.einsum("akbk->ab", gram_rows.reshape(C1, 4, C1, 4))   # sum_q x2 x2^T
    # Elementwise-mul + sum (no dot): exact f32 regardless of matmul precision.
    col_sum2 = jnp.sum(w2_t * s2[None, :], axis=1)                             # (ncol2,)
    col_ssq2 = jnp.sum((w2_t[:, :, None] * w2_t[:, None, :]) * g2[None], axis=(1, 2))
    scale2, shift2 = _bn_rows_from_col_moments(
        col_sum2, col_ssq2, params["gamma2"], params["beta2"],
        float(4 * M2), eps)                                  # N*4H*4W samples

    # ---- layer 2 apply: free reshape hand-off, fused BN2 + ReLU -------------
    # Row-major reshape (4*C1, M1) -> (C1, 4*M1): layer-2 pixel order becomes
    # (kh1, kw1, n, h, w), irrelevant for a per-pixel matmul and BN.
    x2_t = a1.reshape(C1, M2)
    w2_k = w2_t.astype(x2_t.dtype)
    tm2 = _choose_tile(M2, tm)
    n2 = pl.cdiv(M2, tm2)
    a2 = pl.pallas_call(
        _deconv_bn_relu_kernel,
        out_shape=jax.ShapeDtypeStruct((ncol2, M2), jnp.float32),
        grid_spec=pltpu.PrefetchScalarGridSpec(
            num_scalar_prefetch=0,
            grid=(n2,),
            in_specs=[
                pl.BlockSpec((C1, tm2), lambda i: (0, i)),
                pl.BlockSpec((ncol2, C1), lambda i: (0, 0)),
                pl.BlockSpec((ncol2, 1), lambda i: (0, 0)),
                pl.BlockSpec((ncol2, 1), lambda i: (0, 0)),
            ],
            out_specs=pl.BlockSpec((ncol2, tm2), lambda i: (0, i)),
        ),
        compiler_params=cparams,
    )(x2_t, w2_k, scale2, shift2)

    # ---- final de-interleave back to NCHW ------------------------------------
    # TODO(synk): the (kh,kw)->spatial scatter is strided in both H and W and is
    # not expressible as rectangular BlockSpec output blocks, so it stays as one
    # XLA transpose of the final tensor.
    out = a2.reshape(C2, 2, 2, 2, 2, N, H, W)            # (c2,kh2,kw2,kh1,kw1,n,h,w)
    out = jnp.transpose(out, (5, 0, 6, 3, 1, 7, 4, 2))   # (n,c2,h,kh1,kh2,w,kw1,kw2)
    return out.reshape(N, C2, 4 * H, 4 * W)


# ----------------------------------------------------------------------------
# Pure-JAX reference (independent einsum path, bias included) for checking
# ----------------------------------------------------------------------------
def _ref_layer(x_nhwc, w, b, gamma, beta, eps=1e-5):
    N, H, W, Cin = x_nhwc.shape
    Cout, kH, kW = w.shape[1], w.shape[2], w.shape[3]
    t = jnp.einsum("nijc,cokl->nijklo", x_nhwc, w,
                   precision=jax.lax.Precision.HIGHEST)
    t = jnp.transpose(t, (0, 1, 3, 2, 4, 5)).reshape(N, H * kH, W * kW, Cout) + b
    mean = t.mean(axis=(0, 1, 2))
    var = ((t - mean) ** 2).mean(axis=(0, 1, 2))
    y = (t - mean) / jnp.sqrt(var + eps) * gamma + beta
    return jnp.maximum(y, 0.0)


def _ref_forward(x_nchw, p):
    x = jnp.transpose(x_nchw, (0, 2, 3, 1))
    x = _ref_layer(x, p["w1"], p["b1"], p["gamma1"], p["beta1"])
    x = _ref_layer(x, p["w2"], p["b2"], p["gamma2"], p["beta2"])
    return jnp.transpose(x, (0, 3, 1, 2))


# ----------------------------------------------------------------------------
if __name__ == "__main__":
    key = jax.random.PRNGKey(0)
    k_x, k_w1, k_b1, k_w2, k_b2 = jax.random.split(key, 5)

    N, Cin, Cout, H, W = 2, 4, 8, 16, 16
    x = jax.random.normal(k_x, (N, Cin, H, W), dtype=jnp.float32)

    params = {
        # ConvTranspose2d weight layout: (in_channels, out_channels, kH, kW)
        "w1": jax.random.normal(k_w1, (Cin, Cout, 2, 2), dtype=jnp.float32) * 0.1,
        "b1": jax.random.normal(k_b1, (Cout,), dtype=jnp.float32) * 0.1,
        "gamma1": jnp.ones((Cout,), dtype=jnp.float32),
        "beta1": jnp.zeros((Cout,), dtype=jnp.float32),
        "w2": jax.random.normal(k_w2, (Cout, Cout, 2, 2), dtype=jnp.float32) * 0.1,
        "b2": jax.random.normal(k_b2, (Cout,), dtype=jnp.float32) * 0.1,
        "gamma2": jnp.ones((Cout,), dtype=jnp.float32),
        "beta2": jnp.zeros((Cout,), dtype=jnp.float32),
    }

    fwd = jax.jit(double_deconv2d_bn_forward)
    out = jax.block_until_ready(fwd(x, params))

    ref = jax.block_until_ready(_ref_forward(x, params))
    assert out.shape == (N, Cout, 4 * H, 4 * W), out.shape
    max_diff = float(jnp.max(jnp.abs(out - ref)))
    assert jnp.allclose(out, ref, atol=1e-3, rtol=1e-3), max_diff

    print("KERNEL_OK")
</pallas_src>

<mosaic_0001>
module attributes {stable_mosaic.version = 11 : i64} {
  func.func @_deconv_stats_kernel(%arg0: i32, %arg1: memref<4x512xf32, #tpu.memory_space<vmem>>, %arg2: memref<32x4xf32, #tpu.memory_space<vmem>>, %arg3: memref<1x32x1xf32, #tpu.memory_space<vmem>>, %arg4: memref<1x32x1xf32, #tpu.memory_space<vmem>>) attributes {dimension_semantics = [#tpu.dimension_semantics<parallel>], iteration_bounds = array<i64: 1>, scalar_prefetch = 0 : i64, scratch_operands = 0 : i64, tpu.core_type = #tpu.core_type<tc>, window_params = [{transform_indices = @transform_0, window_bounds = array<i64: 4, 512>}, {pipeline_mode = #tpu.pipeline_mode<synchronous>, transform_indices = @transform_1, window_bounds = array<i64: 32, 4>}, {transform_indices = @transform_2, window_bounds = array<i64: 1, 32, 1>}, {transform_indices = @transform_3, window_bounds = array<i64: 1, 32, 1>}]} {
    %c0 = arith.constant 0 : index
    %c0_0 = arith.constant 0 : index
    %0 = vector.load %arg2[%c0, %c0_0] : memref<32x4xf32, #tpu.memory_space<vmem>>, vector<32x4xf32>
    %c0_1 = arith.constant 0 : index
    %c0_2 = arith.constant 0 : index
    %1 = vector.load %arg1[%c0_1, %c0_2] : memref<4x512xf32, #tpu.memory_space<vmem>>, vector<4x512xf32>
    %cst = arith.constant dense<0.000000e+00> : vector<32x512xf32>
    %2 = tpu.matmul %0, %1, %cst {dimension_numbers = #tpu.dot_dimension_numbers<[1], [0], [0], [1], [0, 0, 1, 1], [], []>} : vector<32x4xf32>, vector<4x512xf32>, vector<32x512xf32> -> vector<32x512xf32>
    %cst_3 = arith.constant dense<0.000000e+00> : vector<32xf32>
    %3 = vector.multi_reduction <add>, %2, %cst_3 [1] : vector<32x512xf32> to vector<32xf32>
    %4 = vector.shape_cast %3 : vector<32xf32> to vector<32x1xf32>
    %5 = vector.shape_cast %4 : vector<32x1xf32> to vector<1x32x1xf32>
    %c0_4 = arith.constant 0 : index
    %c0_5 = arith.constant 0 : index
    %c0_6 = arith.constant 0 : index
    %6 = vector.load %arg3[%c0_4, %c0_5, %c0_6] : memref<1x32x1xf32, #tpu.memory_space<vmem>>, vector<1x32x1xf32>
    tpu.vector_store %arg3[%c0_4, %c0_5, %c0_6], %5 {strides = array<i32>} : memref<1x32x1xf32, #tpu.memory_space<vmem>>, vector<1x32x1xf32>,
    %7 = arith.mulf %2, %2 : vector<32x512xf32>
    %cst_7 = arith.constant dense<0.000000e+00> : vector<32xf32>
    %8 = vector.multi_reduction <add>, %7, %cst_7 [1] : vector<32x512xf32> to vector<32xf32>
    %9 = vector.shape_cast %8 : vector<32xf32> to vector<32x1xf32>
    %10 = vector.shape_cast %9 : vector<32x1xf32> to vector<1x32x1xf32>
    %c0_8 = arith.constant 0 : index
    %c0_9 = arith.constant 0 : index
    %c0_10 = arith.constant 0 : index
    %11 = vector.load %arg4[%c0_8, %c0_9, %c0_10] : memref<1x32x1xf32, #tpu.memory_space<vmem>>, vector<1x32x1xf32>
    tpu.vector_store %arg4[%c0_8, %c0_9, %c0_10], %10 {strides = array<i32>} : memref<1x32x1xf32, #tpu.memory_space<vmem>>, vector<1x32x1xf32>,
    return
  }
  func.func @transform_0(%arg0: i32) -> (i32, i32) {
    %c0_i32 = arith.constant 0 : i32
    %c0_i32_0 = arith.constant 0 : i32
    return %c0_i32, %arg0 : i32, i32
  }
  func.func @transform_1(%arg0: i32) -> (i32, i32) {
    %c0_i32 = arith.constant 0 : i32
    %c0_i32_0 = arith.constant 0 : i32
    %c0_i32_1 = arith.constant 0 : i32
    return %c0_i32, %c0_i32_0 : i32, i32
  }
  func.func @transform_2(%arg0: i32) -> (i32, i32, i32) {
    %c0_i32 = arith.constant 0 : i32
    %c0_i32_0 = arith.constant 0 : i32
    %c0_i32_1 = arith.constant 0 : i32
    return %arg0, %c0_i32, %c0_i32_0 : i32, i32, i32
  }
  func.func @transform_3(%arg0: i32) -> (i32, i32, i32) {
    %c0_i32 = arith.constant 0 : i32
    %c0_i32_0 = arith.constant 0 : i32
    %c0_i32_1 = arith.constant 0 : i32
    return %arg0, %c0_i32, %c0_i32_0 : i32, i32, i32
  }
}

module attributes {stable_mosaic.version = 11 : i64} {
  func.func @_deconv_bn_relu_emit_stats_kernel(%arg0: i32, %arg1: memref<4x512xf32, #tpu.memory_space<vmem>>, %arg2: memref<32x4xf32, #tpu.memory_space<vmem>>, %arg3: memref<32x1xf32, #tpu.memory_space<vmem>>, %arg4: memref<32x1xf32, #tpu.memory_space<vmem>>, %arg5: memref<32x512xf32, #tpu.memory_space<vmem>>, %arg6: memref<1x32x1xf32, #tpu.memory_space<vmem>>, %arg7: memref<1x32x32xf32, #tpu.memory_space<vmem>>) attributes {dimension_semantics = [#tpu.dimension_semantics<parallel>], iteration_bounds = array<i64: 1>, scalar_prefetch = 0 : i64, scratch_operands = 0 : i64, tpu.core_type = #tpu.core_type<tc>, window_params = [{transform_indices = @transform_0, window_bounds = array<i64: 4, 512>}, {pipeline_mode = #tpu.pipeline_mode<synchronous>, transform_indices = @transform_1, window_bounds = array<i64: 32, 4>}, {pipeline_mode = #tpu.pipeline_mode<synchronous>, transform_indices = @transform_2, window_bounds = array<i64: 32, 1>}, {pipeline_mode = #tpu.pipeline_mode<synchronous>, transform_indices = @transform_3, window_bounds = array<i64: 32, 1>}, {transform_indices = @transform_4, window_bounds = array<i64: 32, 512>}, {transform_indices = @transform_5, window_bounds = array<i64: 1, 32, 1>}, {transform_indices = @transform_6, window_bounds = array<i64: 1, 32, 32>}]} {
    %c0 = arith.constant 0 : index
    %c0_0 = arith.constant 0 : index
    %0 = vector.load %arg2[%c0, %c0_0] : memref<32x4xf32, #tpu.memory_space<vmem>>, vector<32x4xf32>
    %c0_1 = arith.constant 0 : index
    %c0_2 = arith.constant 0 : index
    %1 = vector.load %arg1[%c0_1, %c0_2] : memref<4x512xf32, #tpu.memory_space<vmem>>, vector<4x512xf32>
    %cst = arith.constant dense<0.000000e+00> : vector<32x512xf32>
    %2 = tpu.matmul %0, %1, %cst {dimension_numbers = #tpu.dot_dimension_numbers<[1], [0], [0], [1], [0, 0, 1, 1], [], []>} : vector<32x4xf32>, vector<4x512xf32>, vector<32x512xf32> -> vector<32x512xf32>
    %c0_3 = arith.constant 0 : index
    %c0_4 = arith.constant 0 : index
    %3 = vector.load %arg3[%c0_3, %c0_4] : memref<32x1xf32, #tpu.memory_space<vmem>>, vector<32x1xf32>
    %4 = vector.broadcast %3 : vector<32x1xf32> to vector<32x512xf32>
    %5 = arith.mulf %2, %4 : vector<32x512xf32>
    %c0_5 = arith.constant 0 : index
    %c0_6 = arith.constant 0 : index
    %6 = vector.load %arg4[%c0_5, %c0_6] : memref<32x1xf32, #tpu.memory_space<vmem>>, vector<32x1xf32>
    %7 = vector.broadcast %6 : vector<32x1xf32> to vector<32x512xf32>
    %8 = arith.addf %5, %7 : vector<32x512xf32>
    %cst_7 = arith.constant 0.000000e+00 : f32
    %9 = vector.broadcast %cst_7 : f32 to vector<32x512xf32>
    %10 = arith.maximumf %8, %9 : vector<32x512xf32>
    %c0_8 = arith.constant 0 : index
    %c0_9 = arith.constant 0 : index
    %11 = vector.load %arg5[%c0_8, %c0_9] : memref<32x512xf32, #tpu.memory_space<vmem>>, vector<32x512xf32>
    tpu.vector_store %arg5[%c0_8, %c0_9], %10 {strides = array<i32>} : memref<32x512xf32, #tpu.memory_space<vmem>>, vector<32x512xf32>,
    %cst_10 = arith.constant dense<0.000000e+00> : vector<32xf32>
    %12 = vector.multi_reduction <add>, %10, %cst_10 [1] : vector<32x512xf32> to vector<32xf32>
    %13 = vector.shape_cast %12 : vector<32xf32> to vector<32x1xf32>
    %14 = vector.shape_cast %13 : vector<32x1xf32> to vector<1x32x1xf32>
    %c0_11 = arith.constant 0 : index
    %c0_12 = arith.constant 0 : index
    %c0_13 = arith.constant 0 : index
    %15 = vector.load %arg6[%c0_11, %c0_12, %c0_13] : memref<1x32x1xf32, #tpu.memory_space<vmem>>, vector<1x32x1xf32>
    tpu.vector_store %arg6[%c0_11, %c0_12, %c0_13], %14 {strides = array<i32>} : memref<1x32x1xf32, #tpu.memory_space<vmem>>, vector<1x32x1xf32>,
    %cst_14 = arith.constant dense<0.000000e+00> : vector<32x32xf32>
    %16 = tpu.matmul %10, %10, %cst_14 {dimension_numbers = #tpu.dot_dimension_numbers<[1], [1], [0], [0], [0, 0, 1, 0], [], []>} : vector<32x512xf32>, vector<32x512xf32>, vector<32x32xf32> -> vector<32x32xf32>
    %17 = vector.shape_cast %16 : vector<32x32xf32> to vector<1x32x32xf32>
    %c0_15 = arith.constant 0 : index
    %c0_16 = arith.constant 0 : index
    %c0_17 = arith.constant 0 : index
    %18 = vector.load %arg7[%c0_15, %c0_16, %c0_17] : memref<1x32x32xf32, #tpu.memory_space<vmem>>, vector<1x32x32xf32>
    tpu.vector_store %arg7[%c0_15, %c0_16, %c0_17], %17 {strides = array<i32>} : memref<1x32x32xf32, #tpu.memory_space<vmem>>, vector<1x32x32xf32>,
    return
  }
  func.func @transform_0(%arg0: i32) -> (i32, i32) {
    %c0_i32 = arith.constant 0 : i32
    %c0_i32_0 = arith.constant 0 : i32
    return %c0_i32, %arg0 : i32, i32
  }
  func.func @transform_1(%arg0: i32) -> (i32, i32) {
    %c0_i32 = arith.constant 0 : i32
    %c0_i32_0 = arith.constant 0 : i32
    %c0_i32_1 = arith.constant 0 : i32
    return %c0_i32, %c0_i32_0 : i32, i32
  }
  func.func @transform_2(%arg0: i32) -> (i32, i32) {
    %c0_i32 = arith.constant 0 : i32
    %c0_i32_0 = arith.constant 0 : i32
    %c0_i32_1 = arith.constant 0 : i32
    return %c0_i32, %c0_i32_0 : i32, i32
  }
  func.func @transform_3(%arg0: i32) -> (i32, i32) {
    %c0_i32 = arith.constant 0 : i32
    %c0_i32_0 = arith.constant 0 : i32
    %c0_i32_1 = arith.constant 0 : i32
    return %c0_i32, %c0_i32_0 : i32, i32
  }
  func.func @transform_4(%arg0: i32) -> (i32, i32) {
    %c0_i32 = arith.constant 0 : i32
    %c0_i32_0 = arith.constant 0 : i32
    return %c0_i32, %arg0 : i32, i32
  }
  func.func @transform_5(%arg0: i32) -> (i32, i32, i32) {
    %c0_i32 = arith.constant 0 : i32
    %c0_i32_0 = arith.constant 0 : i32
    %c0_i32_1 = arith.constant 0 : i32
    return %arg0, %c0_i32, %c0_i32_0 : i32, i32, i32
  }
  func.func @transform_6(%arg0: i32) -> (i32, i32, i32) {
    %c0_i32 = arith.constant 0 : i32
    %c0_i32_0 = arith.constant 0 : i32
    %c0_i32_1 = arith.constant 0 : i32
    return %arg0, %c0_i32, %c0_i32_0 : i32, i32, i32
  }
}

module attributes {stable_mosaic.version = 11 : i64} {
  func.func @_deconv_bn_relu_kernel(%arg0: i32, %arg1: memref<8x2048xf32, #tpu.memory_space<vmem>>, %arg2: memref<32x8xf32, #tpu.memory_space<vmem>>, %arg3: memref<32x1xf32, #tpu.memory_space<vmem>>, %arg4: memref<32x1xf32, #tpu.memory_space<vmem>>, %arg5: memref<32x2048xf32, #tpu.memory_space<vmem>>) attributes {dimension_semantics = [#tpu.dimension_semantics<parallel>], iteration_bounds = array<i64: 1>, scalar_prefetch = 0 : i64, scratch_operands = 0 : i64, tpu.core_type = #tpu.core_type<tc>, window_params = [{transform_indices = @transform_0, window_bounds = array<i64: 8, 2048>}, {pipeline_mode = #tpu.pipeline_mode<synchronous>, transform_indices = @transform_1, window_bounds = array<i64: 32, 8>}, {pipeline_mode = #tpu.pipeline_mode<synchronous>, transform_indices = @transform_2, window_bounds = array<i64: 32, 1>}, {pipeline_mode = #tpu.pipeline_mode<synchronous>, transform_indices = @transform_3, window_bounds = array<i64: 32, 1>}, {transform_indices = @transform_4, window_bounds = array<i64: 32, 2048>}]} {
    %c0 = arith.constant 0 : index
    %c0_0 = arith.constant 0 : index
    %0 = vector.load %arg2[%c0, %c0_0] : memref<32x8xf32, #tpu.memory_space<vmem>>, vector<32x8xf32>
    %c0_1 = arith.constant 0 : index
    %c0_2 = arith.constant 0 : index
    %1 = vector.load %arg1[%c0_1, %c0_2] : memref<8x2048xf32, #tpu.memory_space<vmem>>, vector<8x2048xf32>
    %cst = arith.constant dense<0.000000e+00> : vector<32x2048xf32>
    %2 = tpu.matmul %0, %1, %cst {dimension_numbers = #tpu.dot_dimension_numbers<[1], [0], [0], [1], [0, 0, 1, 1], [], []>} : vector<32x8xf32>, vector<8x2048xf32>, vector<32x2048xf32> -> vector<32x2048xf32>
    %c0_3 = arith.constant 0 : index
    %c0_4 = arith.constant 0 : index
    %3 = vector.load %arg3[%c0_3, %c0_4] : memref<32x1xf32, #tpu.memory_space<vmem>>, vector<32x1xf32>
    %4 = vector.broadcast %3 : vector<32x1xf32> to vector<32x2048xf32>
    %5 = arith.mulf %2, %4 : vector<32x2048xf32>
    %c0_5 = arith.constant 0 : index
    %c0_6 = arith.constant 0 : index
    %6 = vector.load %arg4[%c0_5, %c0_6] : memref<32x1xf32, #tpu.memory_space<vmem>>, vector<32x1xf32>
    %7 = vector.broadcast %6 : vector<32x1xf32> to vector<32x2048xf32>
    %8 = arith.addf %5, %7 : vector<32x2048xf32>
    %cst_7 = arith.constant 0.000000e+00 : f32
    %9 = vector.broadcast %cst_7 : f32 to vector<32x2048xf32>
    %10 = arith.maximumf %8, %9 : vector<32x2048xf32>
    %c0_8 = arith.constant 0 : index
    %c0_9 = arith.constant 0 : index
    %11 = vector.load %arg5[%c0_8, %c0_9] : memref<32x2048xf32, #tpu.memory_space<vmem>>, vector<32x2048xf32>
    tpu.vector_store %arg5[%c0_8, %c0_9], %10 {strides = array<i32>} : memref<32x2048xf32, #tpu.memory_space<vmem>>, vector<32x2048xf32>,
    return
  }
  func.func @transform_0(%arg0: i32) -> (i32, i32) {
    %c0_i32 = arith.constant 0 : i32
    %c0_i32_0 = arith.constant 0 : i32
    return %c0_i32, %arg0 : i32, i32
  }
  func.func @transform_1(%arg0: i32) -> (i32, i32) {
    %c0_i32 = arith.constant 0 : i32
    %c0_i32_0 = arith.constant 0 : i32
    %c0_i32_1 = arith.constant 0 : i32
    return %c0_i32, %c0_i32_0 : i32, i32
  }
  func.func @transform_2(%arg0: i32) -> (i32, i32) {
    %c0_i32 = arith.constant 0 : i32
    %c0_i32_0 = arith.constant 0 : i32
    %c0_i32_1 = arith.constant 0 : i32
    return %c0_i32, %c0_i32_0 : i32, i32
  }
  func.func @transform_3(%arg0: i32) -> (i32, i32) {
    %c0_i32 = arith.constant 0 : i32
    %c0_i32_0 = arith.constant 0 : i32
    %c0_i32_1 = arith.constant 0 : i32
    return %c0_i32, %c0_i32_0 : i32, i32
  }
  func.func @transform_4(%arg0: i32) -> (i32, i32) {
    %c0_i32 = arith.constant 0 : i32
    %c0_i32_0 = arith.constant 0 : i32
    return %c0_i32, %arg0 : i32, i32
  }
}

</mosaic_0001>

<bundles_post_ra>
// kernel: double_deconv2d_bn_forward.3
= control target key start
LH: loop header
LB: loop body
LE: loop exit
PB: predicated region body
PF: predicated region fallthrough
CT: control target
= control target key end

     0   :  { %vm36_vm0 = vcmask 1043456   ;;  %v311_v1 = vmov 0.0   ;;  %vm23_vm1 = vcmask 31744   ;;  %vm243_vm2 = vcmask 7168   ;;  %s390_s0 = inlined_call_operand.vmem [shape: f32[4,512], index: 0, kind: input, shape index: {}]   ;;  %s391_s1 = inlined_call_operand.vmem [shape: f32[32,4], index: 1, kind: input, shape index: {}]   ;;  %s392_s2 = inlined_call_operand.vmem [shape: f32[1,32,1], index: 2, kind: output, shape index: {0}]   ;;  %s393_s3 = inlined_call_operand.vmem [shape: f32[1,32,1], index: 3, kind: output, shape index: {1}]  }
   0x1   :  { %v17_v0 = vld [vmem:[%s390_s0] sm:$0xff]  ;;  %109 = vmatprep.mubr.f32.mxu0 %v311_v1  ;;  %v18_v2 = vld [vmem:[%s390_s0 + $0x8] sm:$0xff]  ;;  %198 = vmatprep.mubr.f32.mxu1 %v311_v1  ;;  %v15_v7 = vld [vmem:[%s391_s1 + $0x10] sm:$0xff] }
   0x2   :  { %v21_v3 = vcombine.high %v17_v0, %v17_v0  ;;  %v22_v4 = vcombine.high %v18_v2, %v18_v2  ;;  %v13_v5 = vld [vmem:[%s391_s1] sm:$0xff]  ;;  %v14_v6 = vld [vmem:[%s391_s1 + $0x8] sm:$0xff]  ;;  %v16_v8 = vld [vmem:[%s391_s1 + $0x18] sm:$0xff] }
   0x4   :  { %296 = vmatprep.subr.msk.mxu0 %vm36_vm0, %v21_v3  ;;  %302 = vmatprep.subr.msk.mxu1 %vm36_vm0, %v22_v4 }
   0x5   :  { %297 = vmatpush1.msk.msra.mxu0 %vm36_vm0, %v17_v0  ;;  %303 = vmatpush1.msk.msra.mxu1 %vm36_vm0, %v18_v2 }
   0x6   :  { %298 = vmatmul.mubr.msk.f32.vlgmr.msra.gmra.mxu0 %vm23_vm1, %v13_v5  ;;  %304 = vmatmul.mubr.msk.f32.vlgmr.msra.gmra.mxu1 %vm23_vm1, %v13_v5 }
   0x7   :  { %115 = vmatprep.mubr.f32.mxu0 %v311_v1  ;;  %204 = vmatprep.mubr.f32.mxu1 %v311_v1 }
   0xa   :  { %299 = vmatmul.mubr.msk.f32.gmra.mxu0 %vm23_vm1, %v14_v6  ;;  %305 = vmatmul.mubr.msk.f32.gmra.mxu1 %vm23_vm1, %v14_v6 }
   0xb   :  { %121 = vmatprep.mubr.f32.mxu0 %v311_v1  ;;  %210 = vmatprep.mubr.f32.mxu1 %v311_v1 }
   0xe   :  { %300 = vmatmul.mubr.msk.f32.gmra.mxu0 %vm23_vm1, %v15_v7  ;;  %306 = vmatmul.mubr.msk.f32.gmra.mxu1 %vm23_vm1, %v15_v7 }
   0xf   :  { %127 = vmatprep.mubr.f32.mxu0 %v311_v1  ;;  %216 = vmatprep.mubr.f32.mxu1 %v311_v1 }
  0x12   :  { %301 = vmatmul.mubr.msk.f32.gmra.mxu0 %vm23_vm1, %v16_v8  ;;  %307 = vmatmul.mubr.msk.f32.gmra.mxu1 %vm23_vm1, %v16_v8 }
  0xc6   :  { %v111_v9 = vpop.f32.mrf.mxu0  ;;  %v200_v10 = vpop.f32.mrf.mxu1 }
  0xc7   :  { %v248_v13 = vmul.f32 %v111_v9, %v111_v9  ;;  %v250_v16 = vmul.f32 %v200_v10, %v200_v10 }
  0xc8   :  { %v113_v11 = vpop.f32.mrf.mxu0  ;;  %v202_v12 = vpop.f32.mrf.mxu1 }
  0xc9   :  { %v223_v14 = vadd.f32 %v113_v11, %v111_v9  ;;  %v249_v15 = vmul.f32 %v113_v11, %v113_v11  ;;  %v251_v31 = vmul.f32 %v202_v12, %v202_v12 }
  0xca   :  { %v117_v17 = vpop.f32.mrf.mxu0  ;;  %v206_v18 = vpop.f32.mrf.mxu1 }
  0xcb   :  { %v264_v19 = vadd.f32 %v249_v15, %v248_v13  ;;  %v224_v20 = vadd.f32 %v223_v14, %v200_v10  ;;  %v252_v21 = vmul.f32 %v117_v17, %v117_v17  ;;  %v254_v26 = vmul.f32 %v206_v18, %v206_v18 }
  0xcc   :  { %v119_v22 = vpop.f32.mrf.mxu0  ;;  %v208_v23 = vpop.f32.mrf.mxu1 }
  0xcd   :  { %v228_v24 = vadd.f32 %v119_v22, %v117_v17  ;;  %v253_v25 = vmul.f32 %v119_v22, %v119_v22  ;;  %v225_v27 = vadd.f32 %v224_v20, %v202_v12  ;;  %v265_v30 = vadd.f32 %v264_v19, %v250_v16 }
  0xce   :  { %v123_v28 = vpop.f32.mrf.mxu0  ;;  %v212_v29 = vpop.f32.mrf.mxu1  ;;  %v255_v35 = vmul.f32 %v208_v23, %v208_v23 }
  0xcf   :  { %v269_v32 = vadd.f32 %v253_v25, %v252_v21  ;;  %v256_v33 = vmul.f32 %v123_v28, %v123_v28  ;;  %226 = vadd.xlane.f32.xlu0 %v225_v27  ;;  %v229_v34 = vadd.f32 %v228_v24, %v206_v18  ;;  %v266_v40 = vadd.f32 %v265_v30, %v251_v31 }
  0xd0   :  { %v125_v36 = vpop.f32.mrf.mxu0  ;;  %v214_v37 = vpop.f32.mrf.mxu1  ;;  %v258_v43 = vmul.f32 %v212_v29, %v212_v29 }
  0xd1   :  { %v233_v38 = vadd.f32 %v125_v36, %v123_v28  ;;  %v257_v39 = vmul.f32 %v125_v36, %v125_v36  ;;  %v270_v41 = vadd.f32 %v269_v32, %v254_v26  ;;  %v259_v52 = vmul.f32 %v214_v37, %v214_v37 }
  0xd2   :  { %v129_v42 = vpop.f32.mrf.mxu0  ;;  %v218_v49 = vpop.f32.mrf.mxu1  ;;  %v230_v53 = vadd.f32 %v229_v34, %v208_v23 }
  0xd3   :  { %v274_v44 = vadd.f32 %v257_v39, %v256_v33  ;;  %v260_v45 = vmul.f32 %v129_v42, %v129_v42  ;;  %v234_v46 = vadd.f32 %v233_v38, %v212_v29  ;;  %267 = vadd.xlane.f32.xlu0 %v266_v40  ;;  %v271_v47 = vadd.f32 %v270_v41, %v255_v35 }
  0xd4   :  { %v131_v48 = vpop.f32.mrf.mxu0  ;;  %v262_v57 = vmul.f32 %v218_v49, %v218_v49  ;;  %v220_v59 = vpop.f32.mrf.mxu1 }
  0xd5   :  { %v238_v50 = vadd.f32 %v131_v48, %v129_v42  ;;  %v261_v51 = vmul.f32 %v131_v48, %v131_v48  ;;  %272 = vadd.xlane.f32.xlu1 %v271_v47  ;;  %v275_v54 = vadd.f32 %v274_v44, %v258_v43  ;;  %v235_v58 = vadd.f32 %v234_v46, %v214_v37 }
  0xd6   :  { %v263_v62 = vmul.f32 %v220_v59, %v220_v59 }
  0xd7   :  { %v279_v55 = vadd.f32 %v261_v51, %v260_v45  ;;  %v239_v56 = vadd.f32 %v238_v50, %v218_v49  ;;  %231 = vadd.xlane.f32.xlu0 %v230_v53  ;;  %v276_v60 = vadd.f32 %v275_v54, %v259_v52 }
  0xd9   :  { %236 = vadd.xlane.f32.xlu1 %v235_v58  ;;  %v240_v61 = vadd.f32 %v239_v56, %v220_v59  ;;  %v280_v63 = vadd.f32 %v279_v55, %v262_v57 }
  0xdb   :  { %277 = vadd.xlane.f32.xlu0 %v276_v60  ;;  %v281_v0 = vadd.f32 %v280_v63, %v263_v62 }
  0xdd   :  { %241 = vadd.xlane.f32.xlu1 %v240_v61 }
  0xe1   :  { %282 = vadd.xlane.f32.xlu1 %v281_v0 }
 0x158   :  { %v227_v1 = vpop.xlane.xlu0 %226 }
 0x159   :  { %244 = vst.msk [vmem:[%s392_s2] sm:$0xff] %vm243_vm2, %v227_v1 }
 0x15c   :  { %v268_v2 = vpop.xlane.xlu0 %267 }
 0x15d   :  { %284 = vst.msk [vmem:[%s393_s3] sm:$0xff] %vm243_vm2, %v268_v2 }
 0x15e   :  { %v273_v3 = vpop.xlane.xlu1 %272 }
 0x15f   :  { %285 = vst.msk [vmem:[%s393_s3 + $0x8] sm:$0xff] %vm243_vm2, %v273_v3 }
 0x160   :  { %v232_v4 = vpop.xlane.xlu0 %231 }
 0x161   :  { %245 = vst.msk [vmem:[%s392_s2 + $0x8] sm:$0xff] %vm243_vm2, %v232_v4 }
 0x162   :  { %v237_v5 = vpop.xlane.xlu1 %236 }
 0x163   :  { %246 = vst.msk [vmem:[%s392_s2 + $0x10] sm:$0xff] %vm243_vm2, %v237_v5 }
 0x164   :  { %v278_v6 = vpop.xlane.xlu0 %277 }
 0x165   :  { %286 = vst.msk [vmem:[%s393_s3 + $0x10] sm:$0xff] %vm243_vm2, %v278_v6 }
 0x166   :  { %v242_v7 = vpop.xlane.xlu1 %241 }
 0x167   :  { %247 = vst.msk [vmem:[%s392_s2 + $0x18] sm:$0xff] %vm243_vm2, %v242_v7 }
 0x16a   :  { %v283_v8 = vpop.xlane.xlu1 %282 }
 0x16b   :  { %287 = vst.msk [vmem:[%s393_s3 + $0x18] sm:$0xff] %vm243_vm2, %v283_v8 }

// kernel: double_deconv2d_bn_forward.4
= control target key start
LH: loop header
LB: loop body
LE: loop exit
PB: predicated region body
PF: predicated region fallthrough
CT: control target
= control target key end

     0   :  { %vm43_vm0 = vcmask 1043456   ;;  %v572_v2 = vmov 0.0   ;;  %v573_v5 = vmov 0   ;;  %vm30_vm1 = vcmask 31744   ;;  %s817_s0 = inlined_call_operand.vmem [shape: f32[4,512], index: 0, kind: input, shape index: {}]   ;;  %s818_s1 = inlined_call_operand.vmem [shape: f32[32,4], index: 1, kind: input, shape index: {}]   ;;  %s819_s2 = inlined_call_operand.vmem [shape: f32[32,1], index: 2, kind: input, shape index: {}]   ;;  %s820_s3 = inlined_call_operand.vmem [shape: f32[32,1], index: 3, kind: input, shape index: {}]   ;;  %s821_s4 = inlined_call_operand.vmem [shape: f32[32,512], index: 4, kind: output, shape index: {0}]   ;;  %s822_s5 = inlined_call_operand.vmem [shape: f32[1,32,1], index: 5, kind: output, shape index: {1}]   ;;  %s823_s6 = inlined_call_operand.vmem [shape: f32[1,32,32], index: 6, kind: output, shape index: {2}]  }
   0x1   :  { %v24_v0 = vld [vmem:[%s817_s0] sm:$0xff]  ;;  %v25_v1 = vld [vmem:[%s817_s0 + $0x8] sm:$0xff]  ;;  %116 = vmatprep.mubr.f32.mxu0 %v572_v2  ;;  %205 = vmatprep.mubr.f32.mxu1 %v572_v2  ;;  %v233_v7 = vld [vmem:[%s819_s2 + $0x18] sm:$0xff]  ;;  %vm362_vm2 = vcmask 7168   ;;  %vm537_vm3 = vcmask 261120  }
   0x2   :  { %v28_v3 = vcombine.high %v24_v0, %v24_v0  ;;  %v29_v4 = vcombine.high %v25_v1, %v25_v1  ;;  %568 = vset.pattern.permute.xlu0 %v573_v5  ;;  %569 = vset.pattern.permute.xlu1 %v573_v5  ;;  %v20_v6 = vld [vmem:[%s818_s1] sm:$0xff]  ;;  %v232_v8 = vld [vmem:[%s819_s2 + $0x10] sm:$0xff]  ;;  %v21_v9 = vld [vmem:[%s818_s1 + $0x8] sm:$0xff] }
   0x3   :  { %251 = vperm.xlu0 %568, %v233_v7   ;;  %246 = vperm.xlu1 %569, %v232_v8   ;;  %v273_v10 = vld [vmem:[%s820_s3 + $0x18] sm:$0xff]  ;;  %v272_v11 = vld [vmem:[%s820_s3 + $0x10] sm:$0xff]  ;;  %v231_v13 = vld [vmem:[%s819_s2 + $0x8] sm:$0xff] }
   0x4   :  { %554 = vmatprep.subr.msk.mxu0 %vm43_vm0, %v28_v3  ;;  %560 = vmatprep.subr.msk.mxu1 %vm43_vm0, %v29_v4  ;;  %v22_v12 = vld [vmem:[%s818_s1 + $0x10] sm:$0xff]  ;;  %v271_v14 = vld [vmem:[%s820_s3 + $0x8] sm:$0xff]  ;;  %v23_v15 = vld [vmem:[%s818_s1 + $0x18] sm:$0xff] }
   0x5   :  { %555 = vmatpush1.msk.msra.mxu0 %vm43_vm0, %v24_v0  ;;  %561 = vmatpush1.msk.msra.mxu1 %vm43_vm0, %v25_v1  ;;  %v230_v16 = vld [vmem:[%s819_s2] sm:$0xff] }
   0x6   :  { %556 = vmatmul.mubr.msk.f32.vlgmr.msra.gmra.mxu0 %vm30_vm1, %v20_v6  ;;  %562 = vmatmul.mubr.msk.f32.vlgmr.msra.gmra.mxu1 %vm30_vm1, %v20_v6  ;;  %v270_v17 = vld [vmem:[%s820_s3] sm:$0xff] }
   0x7   :  { %122 = vmatprep.mubr.f32.mxu0 %v572_v2  ;;  %211 = vmatprep.mubr.f32.mxu1 %v572_v2 }
   0x8   :  { %291 = vperm.xlu0 %568, %v273_v10   ;;  %286 = vperm.xlu1 %569, %v272_v11  }
   0xa   :  { %557 = vmatmul.mubr.msk.f32.gmra.mxu0 %vm30_vm1, %v21_v9  ;;  %563 = vmatmul.mubr.msk.f32.gmra.mxu1 %vm30_vm1, %v21_v9 }
   0xb   :  { %128 = vmatprep.mubr.f32.mxu0 %v572_v2  ;;  %217 = vmatprep.mubr.f32.mxu1 %v572_v2 }
   0xc   :  { %241 = vperm.xlu0 %568, %v231_v13   ;;  %281 = vperm.xlu1 %569, %v271_v14  }
   0xe   :  { %558 = vmatmul.mubr.msk.f32.gmra.mxu0 %vm30_vm1, %v22_v12  ;;  %564 = vmatmul.mubr.msk.f32.gmra.mxu1 %vm30_vm1, %v22_v12 }
   0xf   :  { %134 = vmatprep.mubr.f32.mxu0 %v572_v2  ;;  %223 = vmatprep.mubr.f32.mxu1 %v572_v2 }
  0x10   :  { %236 = vperm.xlu0 %568, %v230_v16   ;;  %276 = vperm.xlu1 %569, %v270_v17  }
  0x12   :  { %559 = vmatmul.mubr.msk.f32.gmra.mxu0 %vm30_vm1, %v23_v15  ;;  %565 = vmatmul.mubr.msk.f32.gmra.mxu1 %vm30_vm1, %v23_v15 }
  0x7e   :  { %v663_v18 = vpop.permute.xlu0 %251  ;;  %v247_v19 = vpop.permute.xlu1 %246 }
  0x83   :  { %v665_v20 = vpop.permute.xlu0 %291  ;;  %v667_v21 = vpop.permute.xlu1 %286 }
  0x87   :  { %v242_v22 = vpop.permute.xlu0 %241  ;;  %v282_v23 = vpop.permute.xlu1 %281 }
  0x8b   :  { %v237_v24 = vpop.permute.xlu0 %236  ;;  %v277_v25 = vpop.permute.xlu1 %276 }
  0xc6   :  { %v118_v26 = vpop.f32.mrf.mxu0  ;;  %v207_v27 = vpop.f32.mrf.mxu1 }
  0xc7   :  { %v254_v28 = vmul.f32 %v237_v24, %v118_v26  ;;  %v256_v29 = vmul.f32 %v237_v24, %v207_v27 }
  0xc8   :  { %v120_v30 = vpop.f32.mrf.mxu0  ;;  %v209_v31 = vpop.f32.mrf.mxu1 }
  0xc9   :  { %v294_v32 = vadd.f32 %v277_v25, %v254_v28  ;;  %v296_v33 = vadd.f32 %v277_v25, %v256_v29  ;;  %v255_v34 = vmul.f32 %v237_v24, %v120_v30  ;;  %v257_v35 = vmul.f32 %v237_v24, %v209_v31 }
  0xca   :  { %v124_v36 = vpop.f32.mrf.mxu0  ;;  %v213_v37 = vpop.f32.mrf.mxu1 }
  0xcb   :  { %v669_v38 = vmax.f32 %v294_v32, 0.0  ;;  %v671_v39 = vmax.f32 %v296_v33, 0.0  ;;  %v295_v40 = vadd.f32 %v277_v25, %v255_v34  ;;  %v297_v41 = vadd.f32 %v277_v25, %v257_v35 }
  0xcc   :  { %v258_v42 = vmul.f32 %v242_v22, %v124_v36  ;;  %v260_v43 = vmul.f32 %v242_v22, %v213_v37  ;;  %v126_v44 = vpop.f32.mrf.mxu0  ;;  %v215_v45 = vpop.f32.mrf.mxu1 }
  0xcd   :  { %326 = vst [vmem:[%s821_s4] sm:$0xff] %v669_v38  ;;  %328 = vst [vmem:[%s821_s4 + $0x10] sm:$0xff] %v671_v39  ;;  %v681_v46 = vmax.f32 %v295_v40, 0.0  ;;  %v683_v47 = vmax.f32 %v297_v41, 0.0  ;;  %v259_v48 = vmul.f32 %v242_v22, %v126_v44  ;;  %v261_v49 = vmul.f32 %v242_v22, %v215_v45 }
  0xce   :  { %v298_v50 = vadd.f32 %v282_v23, %v258_v42  ;;  %v300_v51 = vadd.f32 %v282_v23, %v260_v43  ;;  %v130_v52 = vpop.f32.mrf.mxu0  ;;  %v219_v53 = vpop.f32.mrf.mxu1 }
  0xcf   :  { %327 = vst [vmem:[%s821_s4 + $0x8] sm:$0xff] %v681_v46  ;;  %329 = vst [vmem:[%s821_s4 + $0x18] sm:$0xff] %v683_v47  ;;  %v299_v54 = vadd.f32 %v282_v23, %v259_v48  ;;  %v301_v55 = vadd.f32 %v282_v23, %v261_v49  ;;  %v262_v56 = vmul.f32 %v247_v19, %v130_v52  ;;  %431 = vmatprep.mubr.f32.mxu0 %v681_v46 }
  0xd0   :  { %v264_v57 = vmul.f32 %v247_v19, %v219_v53  ;;  %v694_v58 = vmax.f32 %v298_v50, 0.0  ;;  %v696_v59 = vmax.f32 %v300_v51, 0.0  ;;  %516 = vmatprep.mubr.f32.mxu1 %v683_v47  ;;  %v132_v60 = vpop.f32.mrf.mxu0  ;;  %v221_v61 = vpop.f32.mrf.mxu1  ;;  %v342_v62 = vadd.f32 %v681_v46, %v669_v38 }
  0xd1   :  { %v701_v63 = vmax.f32 %v299_v54, 0.0  ;;  %v703_v0 = vmax.f32 %v301_v55, 0.0  ;;  %v302_v1 = vadd.f32 %v667_v21, %v262_v56  ;;  %v263_v3 = vmul.f32 %v247_v19, %v132_v60 }
  0xd2   :  { %v304_v2 = vadd.f32 %v667_v21, %v264_v57  ;;  %330 = vst [vmem:[%s821_s4 + $0x20] sm:$0xff] %v694_v58  ;;  %332 = vst [vmem:[%s821_s4 + $0x30] sm:$0xff] %v696_v59  ;;  %v265_v4 = vmul.f32 %v247_v19, %v221_v61  ;;  %v136_v5 = vpop.f32.mrf.mxu0  ;;  %v225_v6 = vpop.f32.mrf.mxu1  ;;  %v343_v7 = vadd.f32 %v342_v62, %v671_v39 }
  0xd3   :  { %331 = vst [vmem:[%s821_s4 + $0x28] sm:$0xff] %v701_v63  ;;  %333 = vst [vmem:[%s821_s4 + $0x38] sm:$0xff] %v703_v0  ;;  %v724_v8 = vmax.f32 %v302_v1, 0.0  ;;  %v266_v10 = vmul.f32 %v663_v18, %v136_v5  ;;  %v268_v11 = vmul.f32 %v663_v18, %v225_v6  ;;  %v303_v12 = vadd.f32 %v667_v21, %v263_v3 }
  0xd4   :  { %v726_v9 = vmax.f32 %v304_v2, 0.0  ;;  %v305_v13 = vadd.f32 %v667_v21, %v265_v4  ;;  %v138_v14 = vpop.f32.mrf.mxu0  ;;  %v227_v15 = vpop.f32.mrf.mxu1  ;;  %v344_v16 = vadd.f32 %v343_v7, %v683_v47  ;;  %v347_v17 = vadd.f32 %v701_v63, %v694_v58 }
  0xd5   :  { %334 = vst [vmem:[%s821_s4 + $0x40] sm:$0xff] %v724_v8  ;;  %v306_v19 = vadd.f32 %v665_v20, %v266_v10  ;;  %v308_v21 = vadd.f32 %v665_v20, %v268_v11  ;;  %v267_v22 = vmul.f32 %v663_v18, %v138_v14  ;;  %v269_v23 = vmul.f32 %v663_v18, %v227_v15 }
  0xd6   :  { %336 = vst [vmem:[%s821_s4 + $0x50] sm:$0xff] %v726_v9  ;;  %v319_v24 = vmax.f32 %v303_v12, 0.0  ;;  %v321_v25 = vmax.f32 %v305_v13, 0.0  ;;  %345 = vadd.xlane.f32.xlu0 %v344_v16  ;;  %v348_v26 = vadd.f32 %v347_v17, %v696_v59 }
  0xd7   :  { %v322_v27 = vmax.f32 %v306_v19, 0.0  ;;  %v324_v28 = vmax.f32 %v308_v21, 0.0  ;;  %v307_v29 = vadd.f32 %v665_v20, %v267_v22  ;;  %v309_v30 = vadd.f32 %v665_v20, %v269_v23 }
  0xd8   :  { %335 = vst [vmem:[%s821_s4 + $0x48] sm:$0xff] %v319_v24  ;;  %337 = vst [vmem:[%s821_s4 + $0x58] sm:$0xff] %v321_v25  ;;  %v349_v18 = vadd.f32 %v348_v26, %v703_v0  ;;  %v352_v31 = vadd.f32 %v319_v24, %v724_v8 }
  0xd9   :  { %338 = vst [vmem:[%s821_s4 + $0x60] sm:$0xff] %v322_v27  ;;  %340 = vst [vmem:[%s821_s4 + $0x70] sm:$0xff] %v324_v28  ;;  %v323_v20 = vmax.f32 %v307_v29, 0.0  ;;  %v325_v32 = vmax.f32 %v309_v30, 0.0 }
  0xda   :  { %350 = vadd.xlane.f32.xlu1 %v349_v18  ;;  %v353_v33 = vadd.f32 %v352_v31, %v726_v9 }
  0xdb   :  { %339 = vst [vmem:[%s821_s4 + $0x68] sm:$0xff] %v323_v20  ;;  %341 = vst [vmem:[%s821_s4 + $0x78] sm:$0xff] %v325_v32  ;;  %391 = vmatprep.subr.mxu0 %v323_v20  ;;  %476 = vmatprep.subr.mxu1 %v325_v32  ;;  %v357_v34 = vadd.f32 %v323_v20, %v322_v27 }
  0xdc   :  { %392 = vmatpush1.xpose.msra.mxu0 %v322_v27  ;;  %477 = vmatpush1.xpose.msra.mxu1 %v324_v28  ;;  %v354_v35 = vadd.f32 %v353_v33, %v321_v25 }
  0xdd   :  { %478 = vmatprep.subr.mxu1 %v321_v25  ;;  %393 = vmatprep.subr.mxu0 %v319_v24  ;;  %v358_v36 = vadd.f32 %v357_v34, %v324_v28 }
  0xde   :  { %355 = vadd.xlane.f32.xlu0 %v354_v35 }
  0xdf   :  { %v359_v37 = vadd.f32 %v358_v36, %v325_v32 }
  0xe0   :  { %394 = vmatpush1.xpose.msra.mxu0 %v724_v8  ;;  %479 = vmatpush1.xpose.msra.mxu1 %v726_v9 }
  0xe1   :  { %395 = vmatprep.subr.mxu0 %v701_v63  ;;  %480 = vmatprep.subr.mxu1 %v703_v0 }
  0xe2   :  { %360 = vadd.xlane.f32.xlu0 %v359_v37 }
  0xe4   :  { %396 = vmatpush1.xpose.msra.mxu0 %v694_v58  ;;  %481 = vmatpush1.xpose.msra.mxu1 %v696_v59 }
  0xe5   :  { %397 = vmatprep.subr.mxu0 %v681_v46  ;;  %482 = vmatprep.subr.mxu1 %v683_v47 }
  0xe8   :  { %398 = vmatpush1.xpose.msra.mxu0 %v669_v38  ;;  %483 = vmatpush1.xpose.msra.mxu1 %v671_v39 }
  0xeb   :  { %432 = vmatmul.mubr.f32.vlgmr.msra.gmra.mxu0 %v669_v38  ;;  %517 = vmatmul.mubr.f32.vlgmr.msra.gmra.mxu1 %v671_v39 }
  0xec   :  { %436 = vmatprep.mubr.f32.mxu0 %v701_v63  ;;  %521 = vmatprep.mubr.f32.mxu1 %v703_v0 }
  0xef   :  { %437 = vmatmul.mubr.f32.gmra.mxu0 %v694_v58  ;;  %522 = vmatmul.mubr.f32.gmra.mxu1 %v696_v59 }
  0xf0   :  { %441 = vmatprep.mubr.f32.mxu0 %v319_v24  ;;  %526 = vmatprep.mubr.f32.mxu1 %v321_v25 }
  0xf3   :  { %442 = vmatmul.mubr.f32.gmra.mxu0 %v724_v8  ;;  %527 = vmatmul.mubr.f32.gmra.mxu1 %v726_v9 }
  0xf4   :  { %446 = vmatprep.mubr.f32.mxu0 %v323_v20  ;;  %531 = vmatprep.mubr.f32.mxu1 %v325_v32 }
  0xf7   :  { %447 = vmatmul.mubr.f32.gmra.mxu0 %v322_v27  ;;  %532 = vmatmul.mubr.f32.gmra.mxu1 %v324_v28 }
 0x15f   :  { %v346_v38 = vpop.xlane.xlu0 %345 }
 0x160   :  { %363 = vst.msk [vmem:[%s822_s5] sm:$0xff] %vm362_vm2, %v346_v38 }
 0x163   :  { %v351_v39 = vpop.xlane.xlu1 %350 }
 0x164   :  { %364 = vst.msk [vmem:[%s822_s5 + $0x8] sm:$0xff] %vm362_vm2, %v351_v39 }
 0x167   :  { %v356_v40 = vpop.xlane.xlu0 %355 }
 0x168   :  { %365 = vst.msk [vmem:[%s822_s5 + $0x10] sm:$0xff] %vm362_vm2, %v356_v40 }
 0x16b   :  { %v361_v41 = vpop.xlane.xlu0 %360 }
 0x16c   :  { %366 = vst.msk [vmem:[%s822_s5 + $0x18] sm:$0xff] %vm362_vm2, %v361_v41 }
 0x1ab   :  { %v433_v42 = vpop.f32.mrf.mxu0  ;;  %v518_v43 = vpop.f32.mrf.mxu1 }
 0x1ac   :  { %v519_v44 = vadd.f32 %v518_v43, %v433_v42 }
 0x1ad   :  { %v435_v45 = vpop.f32.mrf.mxu0  ;;  %v520_v46 = vpop.f32.mrf.mxu1 }
 0x1ae   :  { %538 = vst.msk [vmem:[%s823_s6] sm:$0xff] %vm537_vm3, %v519_v44 }
 0x1af   :  { %v438_v47 = vpop.f32.mrf.mxu0  ;;  %v523_v48 = vpop.f32.mrf.mxu1 }
 0x1b0   :  { %v524_v49 = vadd.f32 %v523_v48, %v438_v47 }
 0x1b1   :  { %v440_v50 = vpop.f32.mrf.mxu0  ;;  %v525_v51 = vpop.f32.mrf.mxu1 }
 0x1b2   :  { %539 = vst.msk [vmem:[%s823_s6 + $0x8] sm:$0xff] %vm537_vm3, %v524_v49 }
 0x1b3   :  { %v443_v52 = vpop.f32.mrf.mxu0  ;;  %v528_v53 = vpop.f32.mrf.mxu1 }
 0x1b4   :  { %v529_v54 = vadd.f32 %v528_v53, %v443_v52 }
 0x1b5   :  { %v445_v55 = vpop.f32.mrf.mxu0  ;;  %v530_v56 = vpop.f32.mrf.mxu1 }
 0x1b6   :  { %540 = vst.msk [vmem:[%s823_s6 + $0x10] sm:$0xff] %vm537_vm3, %v529_v54 }
 0x1b7   :  { %v448_v57 = vpop.f32.mrf.mxu0  ;;  %v533_v58 = vpop.f32.mrf.mxu1 }
 0x1b8   :  { %v534_v59 = vadd.f32 %v533_v58, %v448_v57 }
 0x1b9   :  { %v450_v60 = vpop.f32.mrf.mxu0  ;;  %v535_v61 = vpop.f32.mrf.mxu1 }
 0x1ba   :  { %541 = vst.msk [vmem:[%s823_s6 + $0x18] sm:$0xff] %vm537_vm3, %v534_v59 }

// kernel: double_deconv2d_bn_forward.5
= control target key start
LH: loop header
LB: loop body
LE: loop exit
PB: predicated region body
PF: predicated region fallthrough
CT: control target
= control target key end

     0   :  { %v1106_v3 = vmov 0.0   ;;  %vm37_vm0 = vcmask 64512   ;;  %v1107_v14 = vmov 0   ;;  %s1657_s0 = inlined_call_operand.vmem [shape: f32[8,2048], index: 0, kind: input, shape index: {}]   ;;  %s1658_s1 = inlined_call_operand.vmem [shape: f32[32,8], index: 1, kind: input, shape index: {}]   ;;  %s1659_s2 = inlined_call_operand.vmem [shape: f32[32,1], index: 2, kind: input, shape index: {}]   ;;  %s1660_s3 = inlined_call_operand.vmem [shape: f32[32,1], index: 3, kind: input, shape index: {}]   ;;  %s1661_s4 = inlined_call_operand.vmem [shape: f32[32,2048], index: 4, kind: output, shape index: {}]  }
   0x1   :  { %v22_v0 = vld [vmem:[%s1657_s0 + $0x8] sm:$0xff]  ;;  %v24_v1 = vld [vmem:[%s1657_s0 + $0x18] sm:$0xff]  ;;  %v21_v2 = vld [vmem:[%s1657_s0] sm:$0xff]  ;;  %114 = vmatprep.mubr.f32.mxu0 %v1106_v3  ;;  %203 = vmatprep.mubr.f32.mxu1 %v1106_v3 }
   0x2   :  { %80 = vmatprep.subr.mxu0 %v22_v0  ;;  %169 = vmatprep.subr.mxu1 %v24_v1  ;;  %v23_v4 = vld [vmem:[%s1657_s0 + $0x10] sm:$0xff]  ;;  %v1150_v5 = vld [vmem:[%s1658_s1] sm:$0xff]  ;;  %v26_v6 = vld [vmem:[%s1657_s0 + $0x28] sm:$0xff] }
   0x3   :  { %81 = vmatpush1.msra.mxu0 %v21_v2  ;;  %170 = vmatpush1.msra.mxu1 %v23_v4  ;;  %v28_v7 = vld [vmem:[%s1657_s0 + $0x38] sm:$0xff]  ;;  %v25_v8 = vld [vmem:[%s1657_s0 + $0x20] sm:$0xff]  ;;  %v27_v9 = vld [vmem:[%s1657_s0 + $0x30] sm:$0xff] }
   0x4   :  { %1070 = vmatmul.mubr.msk.f32.vlgmr.msra.gmra.mxu0 %vm37_vm0, %v1150_v5  ;;  %1074 = vmatmul.mubr.msk.f32.vlgmr.msra.gmra.mxu1 %vm37_vm0, %v1150_v5  ;;  %v1171_v10 = vld [vmem:[%s1658_s1 + $0x8] sm:$0xff]  ;;  %v32_v12 = vld [vmem:[%s1657_s0 + $0x58] sm:$0xff]  ;;  %v1190_v13 = vld [vmem:[%s1658_s1 + $0x10] sm:$0xff] }
   0x5   :  { %258 = vmatprep.subr.mxu0 %v26_v6  ;;  %347 = vmatprep.subr.mxu1 %v28_v7  ;;  %v30_v11 = vld [vmem:[%s1657_s0 + $0x48] sm:$0xff]  ;;  %v762_v15 = vld [vmem:[%s1659_s2] sm:$0xff]  ;;  %v764_v16 = vld [vmem:[%s1659_s2 + $0x10] sm:$0xff] }
   0x6   :  { %259 = vmatpush1.msra.mxu0 %v25_v8  ;;  %348 = vmatpush1.msra.mxu1 %v27_v9  ;;  %v1207_v17 = vld [vmem:[%s1658_s1 + $0x18] sm:$0xff]  ;;  %v763_v18 = vld [vmem:[%s1659_s2 + $0x8] sm:$0xff]  ;;  %v29_v20 = vld [vmem:[%s1657_s0 + $0x40] sm:$0xff] }
   0x7   :  { %120 = vmatprep.mubr.f32.mxu0 %v1106_v3  ;;  %209 = vmatprep.mubr.f32.mxu1 %v1106_v3  ;;  %v765_v19 = vld [vmem:[%s1659_s2 + $0x18] sm:$0xff]  ;;  %v31_v21 = vld [vmem:[%s1657_s0 + $0x50] sm:$0xff]  ;;  %v34_v22 = vld [vmem:[%s1657_s0 + $0x68] sm:$0xff] }
   0x8   :  { %1071 = vmatmul.mubr.msk.f32.gmra.mxu0 %vm37_vm0, %v1171_v10  ;;  %1075 = vmatmul.mubr.msk.f32.gmra.mxu1 %vm37_vm0, %v1171_v10  ;;  %v36_v23 = vld [vmem:[%s1657_s0 + $0x78] sm:$0xff]  ;;  %v850_v24 = vld [vmem:[%s1660_s3] sm:$0xff]  ;;  %v851_v25 = vld [vmem:[%s1660_s3 + $0x8] sm:$0xff] }
   0x9   :  { %126 = vmatprep.mubr.f32.mxu0 %v1106_v3  ;;  %215 = vmatprep.mubr.f32.mxu1 %v1106_v3  ;;  %v852_v26 = vld [vmem:[%s1660_s3 + $0x10] sm:$0xff]  ;;  %v853_v27 = vld [vmem:[%s1660_s3 + $0x18] sm:$0xff]  ;;  %v33_v28 = vld [vmem:[%s1657_s0 + $0x60] sm:$0xff] }
   0xa   :  { %436 = vmatprep.subr.mxu0 %v30_v11  ;;  %525 = vmatprep.subr.mxu1 %v32_v12  ;;  %v35_v29 = vld [vmem:[%s1657_s0 + $0x70] sm:$0xff] }
   0xb   :  { %1104 = vset.pattern.permute.xlu0 %v1107_v14  ;;  %1105 = vset.pattern.permute.xlu1 %v1107_v14 }
   0xc   :  { %1072 = vmatmul.mubr.msk.f32.gmra.mxu0 %vm37_vm0, %v1190_v13  ;;  %1076 = vmatmul.mubr.msk.f32.gmra.mxu1 %vm37_vm0, %v1190_v13 }
   0xd   :  { %132 = vmatprep.mubr.f32.mxu0 %v1106_v3  ;;  %221 = vmatprep.mubr.f32.mxu1 %v1106_v3 }
   0xe   :  { %768 = vperm.xlu0 %1104, %v762_v15   ;;  %778 = vperm.xlu1 %1105, %v764_v16  }
  0x10   :  { %1073 = vmatmul.mubr.msk.f32.gmra.mxu0 %vm37_vm0, %v1207_v17  ;;  %1077 = vmatmul.mubr.msk.f32.gmra.mxu1 %vm37_vm0, %v1207_v17 }
  0x11   :  { %292 = vmatprep.mubr.f32.mxu0 %v1106_v3  ;;  %381 = vmatprep.mubr.f32.mxu1 %v1106_v3 }
  0x12   :  { %773 = vperm.xlu0 %1104, %v763_v18   ;;  %783 = vperm.xlu1 %1105, %v765_v19  }
  0x14   :  { %1078 = vmatmul.mubr.msk.f32.vlgmr.msra.gmra.mxu0 %vm37_vm0, %v1150_v5  ;;  %1082 = vmatmul.mubr.msk.f32.vlgmr.msra.gmra.mxu1 %vm37_vm0, %v1150_v5 }
  0x15   :  { %437 = vmatpush1.msra.mxu0 %v29_v20  ;;  %526 = vmatpush1.msra.mxu1 %v31_v21 }
  0x16   :  { %298 = vmatprep.mubr.f32.mxu0 %v1106_v3  ;;  %387 = vmatprep.mubr.f32.mxu1 %v1106_v3 }
  0x17   :  { %614 = vmatprep.subr.mxu0 %v34_v22  ;;  %703 = vmatprep.subr.mxu1 %v36_v23 }
  0x18   :  { %1079 = vmatmul.mubr.msk.f32.gmra.mxu0 %vm37_vm0, %v1171_v10  ;;  %1083 = vmatmul.mubr.msk.f32.gmra.mxu1 %vm37_vm0, %v1171_v10 }
  0x19   :  { %304 = vmatprep.mubr.f32.mxu0 %v1106_v3  ;;  %393 = vmatprep.mubr.f32.mxu1 %v1106_v3 }
  0x1a   :  { %856 = vperm.xlu0 %1104, %v850_v24   ;;  %861 = vperm.xlu1 %1105, %v851_v25  }
  0x1c   :  { %1080 = vmatmul.mubr.msk.f32.gmra.mxu0 %vm37_vm0, %v1190_v13  ;;  %1084 = vmatmul.mubr.msk.f32.gmra.mxu1 %vm37_vm0, %v1190_v13 }
  0x1d   :  { %310 = vmatprep.mubr.f32.mxu0 %v1106_v3  ;;  %399 = vmatprep.mubr.f32.mxu1 %v1106_v3 }
  0x1e   :  { %866 = vperm.xlu0 %1104, %v852_v26   ;;  %871 = vperm.xlu1 %1105, %v853_v27  }
  0x20   :  { %1081 = vmatmul.mubr.msk.f32.gmra.mxu0 %vm37_vm0, %v1207_v17  ;;  %1085 = vmatmul.mubr.msk.f32.gmra.mxu1 %vm37_vm0, %v1207_v17 }
  0x21   :  { %470 = vmatprep.mubr.f32.mxu0 %v1106_v3  ;;  %559 = vmatprep.mubr.f32.mxu1 %v1106_v3 }
  0x24   :  { %1086 = vmatmul.mubr.msk.f32.vlgmr.msra.gmra.mxu0 %vm37_vm0, %v1150_v5  ;;  %1090 = vmatmul.mubr.msk.f32.vlgmr.msra.gmra.mxu1 %vm37_vm0, %v1150_v5 }
  0x25   :  { %615 = vmatpush1.msra.mxu0 %v33_v28  ;;  %704 = vmatpush1.msra.mxu1 %v35_v29 }
  0x26   :  { %476 = vmatprep.mubr.f32.mxu0 %v1106_v3  ;;  %565 = vmatprep.mubr.f32.mxu1 %v1106_v3 }
  0x28   :  { %1087 = vmatmul.mubr.msk.f32.gmra.mxu0 %vm37_vm0, %v1171_v10  ;;  %1091 = vmatmul.mubr.msk.f32.gmra.mxu1 %vm37_vm0, %v1171_v10 }
  0x29   :  { %482 = vmatprep.mubr.f32.mxu0 %v1106_v3  ;;  %571 = vmatprep.mubr.f32.mxu1 %v1106_v3 }
  0x2c   :  { %1088 = vmatmul.mubr.msk.f32.gmra.mxu0 %vm37_vm0, %v1190_v13  ;;  %1092 = vmatmul.mubr.msk.f32.gmra.mxu1 %vm37_vm0, %v1190_v13 }
  0x2d   :  { %488 = vmatprep.mubr.f32.mxu0 %v1106_v3  ;;  %577 = vmatprep.mubr.f32.mxu1 %v1106_v3 }
  0x30   :  { %1089 = vmatmul.mubr.msk.f32.gmra.mxu0 %vm37_vm0, %v1207_v17  ;;  %1093 = vmatmul.mubr.msk.f32.gmra.mxu1 %vm37_vm0, %v1207_v17 }
  0x31   :  { %648 = vmatprep.mubr.f32.mxu0 %v1106_v3  ;;  %737 = vmatprep.mubr.f32.mxu1 %v1106_v3 }
  0x34   :  { %1094 = vmatmul.mubr.msk.f32.vlgmr.msra.gmra.mxu0 %vm37_vm0, %v1150_v5  ;;  %1098 = vmatmul.mubr.msk.f32.vlgmr.msra.gmra.mxu1 %vm37_vm0, %v1150_v5 }
  0x35   :  { %654 = vmatprep.mubr.f32.mxu0 %v1106_v3  ;;  %743 = vmatprep.mubr.f32.mxu1 %v1106_v3 }
  0x38   :  { %1095 = vmatmul.mubr.msk.f32.gmra.mxu0 %vm37_vm0, %v1171_v10  ;;  %1099 = vmatmul.mubr.msk.f32.gmra.mxu1 %vm37_vm0, %v1171_v10 }
  0x39   :  { %660 = vmatprep.mubr.f32.mxu0 %v1106_v3  ;;  %749 = vmatprep.mubr.f32.mxu1 %v1106_v3 }
  0x3c   :  { %1096 = vmatmul.mubr.msk.f32.gmra.mxu0 %vm37_vm0, %v1190_v13  ;;  %1100 = vmatmul.mubr.msk.f32.gmra.mxu1 %vm37_vm0, %v1190_v13 }
  0x3d   :  { %666 = vmatprep.mubr.f32.mxu0 %v1106_v3  ;;  %755 = vmatprep.mubr.f32.mxu1 %v1106_v3 }
  0x40   :  { %1097 = vmatmul.mubr.msk.f32.gmra.mxu0 %vm37_vm0, %v1207_v17  ;;  %1101 = vmatmul.mubr.msk.f32.gmra.mxu1 %vm37_vm0, %v1207_v17 }
  0x89   :  { %v1321_v30 = vpop.permute.xlu0 %768  ;;  %v1323_v31 = vpop.permute.xlu1 %778 }
  0x8d   :  { %v1325_v32 = vpop.permute.xlu0 %773  ;;  %v1327_v33 = vpop.permute.xlu1 %783 }
  0x95   :  { %v1329_v34 = vpop.permute.xlu0 %856  ;;  %v1339_v51 = vpop.permute.xlu1 %861 }
  0x99   :  { %v1363_v4 = vpop.permute.xlu0 %866  ;;  %v1385_v21 = vpop.permute.xlu1 %871 }
  0xc4   :  { %v116_v35 = vpop.f32.mrf.mxu0  ;;  %v205_v36 = vpop.f32.mrf.mxu1 }
  0xc5   :  { %v786_v37 = vmul.f32 %v1321_v30, %v116_v35  ;;  %v788_v38 = vmul.f32 %v1321_v30, %v205_v36 }
  0xc6   :  { %v118_v39 = vpop.f32.mrf.mxu0  ;;  %v207_v40 = vpop.f32.mrf.mxu1 }
  0xc7   :  { %v787_v41 = vmul.f32 %v1321_v30, %v118_v39  ;;  %v789_v42 = vmul.f32 %v1321_v30, %v207_v40  ;;  %v874_v43 = vadd.f32 %v1329_v34, %v786_v37  ;;  %v876_v44 = vadd.f32 %v1329_v34, %v788_v38 }
  0xc8   :  { %v122_v45 = vpop.f32.mrf.mxu0  ;;  %v211_v46 = vpop.f32.mrf.mxu1 }
  0xc9   :  { %v875_v47 = vadd.f32 %v1329_v34, %v787_v41  ;;  %v877_v48 = vadd.f32 %v1329_v34, %v789_v42  ;;  %v938_v49 = vmax.f32 %v874_v43, 0.0  ;;  %v940_v50 = vmax.f32 %v876_v44, 0.0 }
  0xca   :  { %v802_v52 = vmul.f32 %v1325_v32, %v122_v45  ;;  %v804_v53 = vmul.f32 %v1325_v32, %v211_v46  ;;  %v124_v54 = vpop.f32.mrf.mxu0  ;;  %v213_v55 = vpop.f32.mrf.mxu1 }
  0xcb   :  { %v939_v56 = vmax.f32 %v875_v47, 0.0  ;;  %v941_v57 = vmax.f32 %v877_v48, 0.0  ;;  %1002 = vst [vmem:[%s1661_s4] sm:$0xff] %v938_v49  ;;  %1004 = vst [vmem:[%s1661_s4 + $0x10] sm:$0xff] %v940_v50  ;;  %v803_v58 = vmul.f32 %v1325_v32, %v124_v54  ;;  %v805_v59 = vmul.f32 %v1325_v32, %v213_v55 }
  0xcc   :  { %v890_v60 = vadd.f32 %v1339_v51, %v802_v52  ;;  %v892_v61 = vadd.f32 %v1339_v51, %v804_v53  ;;  %v128_v62 = vpop.f32.mrf.mxu0  ;;  %v217_v63 = vpop.f32.mrf.mxu1 }
  0xcd   :  { %1003 = vst [vmem:[%s1661_s4 + $0x8] sm:$0xff] %v939_v56  ;;  %1005 = vst [vmem:[%s1661_s4 + $0x18] sm:$0xff] %v941_v57  ;;  %v891_v0 = vadd.f32 %v1339_v51, %v803_v58  ;;  %v893_v1 = vadd.f32 %v1339_v51, %v805_v59  ;;  %v818_v2 = vmul.f32 %v1323_v31, %v128_v62 }
  0xce   :  { %v820_v3 = vmul.f32 %v1323_v31, %v217_v63  ;;  %v954_v5 = vmax.f32 %v890_v60, 0.0  ;;  %v956_v6 = vmax.f32 %v892_v61, 0.0  ;;  %v130_v7 = vpop.f32.mrf.mxu0  ;;  %v219_v8 = vpop.f32.mrf.mxu1 }
  0xcf   :  { %v955_v9 = vmax.f32 %v891_v0, 0.0  ;;  %v957_v10 = vmax.f32 %v893_v1, 0.0  ;;  %v819_v11 = vmul.f32 %v1323_v31, %v130_v7  ;;  %v821_v12 = vmul.f32 %v1323_v31, %v219_v8 }
  0xd0   :  { %1018 = vst [vmem:[%s1661_s4 + $0x80] sm:$0xff] %v954_v5  ;;  %1020 = vst [vmem:[%s1661_s4 + $0x90] sm:$0xff] %v956_v6  ;;  %v906_v13 = vadd.f32 %v1363_v4, %v818_v2  ;;  %v908_v14 = vadd.f32 %v1363_v4, %v820_v3  ;;  %v134_v15 = vpop.f32.mrf.mxu0  ;;  %v223_v16 = vpop.f32.mrf.mxu1 }
  0xd1   :  { %1019 = vst [vmem:[%s1661_s4 + $0x88] sm:$0xff] %v955_v9  ;;  %1021 = vst [vmem:[%s1661_s4 + $0x98] sm:$0xff] %v957_v10  ;;  %v907_v17 = vadd.f32 %v1363_v4, %v819_v11  ;;  %v909_v18 = vadd.f32 %v1363_v4, %v821_v12  ;;  %v834_v19 = vmul.f32 %v1327_v33, %v134_v15 }
  0xd2   :  { %v836_v20 = vmul.f32 %v1327_v33, %v223_v16  ;;  %v970_v22 = vmax.f32 %v906_v13, 0.0  ;;  %v972_v23 = vmax.f32 %v908_v14, 0.0  ;;  %v136_v24 = vpop.f32.mrf.mxu0  ;;  %v225_v25 = vpop.f32.mrf.mxu1 }
  0xd3   :  { %v971_v26 = vmax.f32 %v907_v17, 0.0  ;;  %v973_v27 = vmax.f32 %v909_v18, 0.0  ;;  %v835_v28 = vmul.f32 %v1327_v33, %v136_v24  ;;  %v837_v29 = vmul.f32 %v1327_v33, %v225_v25 }
  0xd4   :  { %1034 = vst [vmem:[%s1661_s4 + $0x100] sm:$0xff] %v970_v22  ;;  %1036 = vst [vmem:[%s1661_s4 + $0x110] sm:$0xff] %v972_v23  ;;  %v922_v35 = vadd.f32 %v1385_v21, %v834_v19  ;;  %v924_v36 = vadd.f32 %v1385_v21, %v836_v20  ;;  %v294_v37 = vpop.f32.mrf.mxu0  ;;  %v383_v38 = vpop.f32.mrf.mxu1 }
  0xd5   :  { %1035 = vst [vmem:[%s1661_s4 + $0x108] sm:$0xff] %v971_v26  ;;  %1037 = vst [vmem:[%s1661_s4 + $0x118] sm:$0xff] %v973_v27  ;;  %v923_v39 = vadd.f32 %v1385_v21, %v835_v28  ;;  %v925_v40 = vadd.f32 %v1385_v21, %v837_v29  ;;  %v790_v41 = vmul.f32 %v1321_v30, %v294_v37 }
  0xd6   :  { %v792_v42 = vmul.f32 %v1321_v30, %v383_v38  ;;  %v986_v43 = vmax.f32 %v922_v35, 0.0  ;;  %v988_v44 = vmax.f32 %v924_v36, 0.0  ;;  %v296_v45 = vpop.f32.mrf.mxu0  ;;  %v385_v46 = vpop.f32.mrf.mxu1 }
  0xd7   :  { %v987_v47 = vmax.f32 %v923_v39, 0.0  ;;  %v989_v48 = vmax.f32 %v925_v40, 0.0  ;;  %v878_v49 = vadd.f32 %v1329_v34, %v790_v41  ;;  %v791_v52 = vmul.f32 %v1321_v30, %v296_v45 }
  0xd8   :  { %v880_v50 = vadd.f32 %v1329_v34, %v792_v42  ;;  %1050 = vst [vmem:[%s1661_s4 + $0x180] sm:$0xff] %v986_v43  ;;  %1052 = vst [vmem:[%s1661_s4 + $0x190] sm:$0xff] %v988_v44  ;;  %v793_v53 = vmul.f32 %v1321_v30, %v385_v46  ;;  %v300_v54 = vpop.f32.mrf.mxu0  ;;  %v389_v55 = vpop.f32.mrf.mxu1 }
  0xd9   :  { %1051 = vst [vmem:[%s1661_s4 + $0x188] sm:$0xff] %v987_v47  ;;  %1053 = vst [vmem:[%s1661_s4 + $0x198] sm:$0xff] %v989_v48  ;;  %v942_v56 = vmax.f32 %v878_v49, 0.0  ;;  %v806_v58 = vmul.f32 %v1325_v32, %v300_v54  ;;  %v808_v59 = vmul.f32 %v1325_v32, %v389_v55  ;;  %v879_v60 = vadd.f32 %v1329_v34, %v791_v52 }
  0xda   :  { %v944_v57 = vmax.f32 %v880_v50, 0.0  ;;  %v881_v61 = vadd.f32 %v1329_v34, %v793_v53  ;;  %v302_v62 = vpop.f32.mrf.mxu0  ;;  %v391_v63 = vpop.f32.mrf.mxu1 }
  0xdb   :  { %1006 = vst [vmem:[%s1661_s4 + $0x20] sm:$0xff] %v942_v56  ;;  %v894_v0 = vadd.f32 %v1339_v51, %v806_v58  ;;  %v896_v1 = vadd.f32 %v1339_v51, %v808_v59  ;;  %v807_v2 = vmul.f32 %v1325_v32, %v302_v62  ;;  %v809_v3 = vmul.f32 %v1325_v32, %v391_v63 }
  0xdc   :  { %1008 = vst [vmem:[%s1661_s4 + $0x30] sm:$0xff] %v944_v57  ;;  %v943_v5 = vmax.f32 %v879_v60, 0.0  ;;  %v945_v6 = vmax.f32 %v881_v61, 0.0  ;;  %v306_v7 = vpop.f32.mrf.mxu0  ;;  %v395_v8 = vpop.f32.mrf.mxu1 }
  0xdd   :  { %v958_v9 = vmax.f32 %v894_v0, 0.0  ;;  %v960_v10 = vmax.f32 %v896_v1, 0.0  ;;  %v895_v11 = vadd.f32 %v1339_v51, %v807_v2  ;;  %v897_v12 = vadd.f32 %v1339_v51, %v809_v3 }
  0xde   :  { %1007 = vst [vmem:[%s1661_s4 + $0x28] sm:$0xff] %v943_v5  ;;  %1009 = vst [vmem:[%s1661_s4 + $0x38] sm:$0xff] %v945_v6  ;;  %v822_v13 = vmul.f32 %v1323_v31, %v306_v7  ;;  %v824_v14 = vmul.f32 %v1323_v31, %v395_v8  ;;  %v308_v15 = vpop.f32.mrf.mxu0  ;;  %v397_v16 = vpop.f32.mrf.mxu1 }
  0xdf   :  { %1022 = vst [vmem:[%s1661_s4 + $0xa0] sm:$0xff] %v958_v9  ;;  %1024 = vst [vmem:[%s1661_s4 + $0xb0] sm:$0xff] %v960_v10  ;;  %v959_v17 = vmax.f32 %v895_v11, 0.0  ;;  %v961_v18 = vmax.f32 %v897_v12, 0.0  ;;  %v823_v19 = vmul.f32 %v1323_v31, %v308_v15  ;;  %v825_v20 = vmul.f32 %v1323_v31, %v397_v16 }
  0xe0   :  { %v910_v22 = vadd.f32 %v1363_v4, %v822_v13  ;;  %v912_v23 = vadd.f32 %v1363_v4, %v824_v14  ;;  %v312_v24 = vpop.f32.mrf.mxu0  ;;  %v401_v25 = vpop.f32.mrf.mxu1 }
  0xe1   :  { %1023 = vst [vmem:[%s1661_s4 + $0xa8] sm:$0xff] %v959_v17  ;;  %1025 = vst [vmem:[%s1661_s4 + $0xb8] sm:$0xff] %v961_v18  ;;  %v911_v26 = vadd.f32 %v1363_v4, %v823_v19  ;;  %v913_v27 = vadd.f32 %v1363_v4, %v825_v20  ;;  %v838_v28 = vmul.f32 %v1327_v33, %v312_v24 }
  0xe2   :  { %v840_v29 = vmul.f32 %v1327_v33, %v401_v25  ;;  %v974_v35 = vmax.f32 %v910_v22, 0.0  ;;  %v976_v36 = vmax.f32 %v912_v23, 0.0  ;;  %v314_v37 = vpop.f32.mrf.mxu0  ;;  %v403_v38 = vpop.f32.mrf.mxu1 }
  0xe3   :  { %v975_v39 = vmax.f32 %v911_v26, 0.0  ;;  %v977_v40 = vmax.f32 %v913_v27, 0.0  ;;  %v926_v41 = vadd.f32 %v1385_v21, %v838_v28  ;;  %v839_v43 = vmul.f32 %v1327_v33, %v314_v37 }
  0xe4   :  { %v928_v42 = vadd.f32 %v1385_v21, %v840_v29  ;;  %1038 = vst [vmem:[%s1661_s4 + $0x120] sm:$0xff] %v974_v35  ;;  %1040 = vst [vmem:[%s1661_s4 + $0x130] sm:$0xff] %v976_v36  ;;  %v841_v44 = vmul.f32 %v1327_v33, %v403_v38  ;;  %v472_v45 = vpop.f32.mrf.mxu0  ;;  %v561_v46 = vpop.f32.mrf.mxu1 }
  0xe5   :  { %1039 = vst [vmem:[%s1661_s4 + $0x128] sm:$0xff] %v975_v39  ;;  %1041 = vst [vmem:[%s1661_s4 + $0x138] sm:$0xff] %v977_v40  ;;  %v990_v47 = vmax.f32 %v926_v41, 0.0  ;;  %v794_v49 = vmul.f32 %v1321_v30, %v472_v45  ;;  %v796_v50 = vmul.f32 %v1321_v30, %v561_v46  ;;  %v927_v52 = vadd.f32 %v1385_v21, %v839_v43 }
  0xe6   :  { %v992_v48 = vmax.f32 %v928_v42, 0.0  ;;  %v929_v53 = vadd.f32 %v1385_v21, %v841_v44  ;;  %v474_v54 = vpop.f32.mrf.mxu0  ;;  %v563_v55 = vpop.f32.mrf.mxu1 }
  0xe7   :  { %1054 = vst [vmem:[%s1661_s4 + $0x1a0] sm:$0xff] %v990_v47  ;;  %v882_v56 = vadd.f32 %v1329_v34, %v794_v49  ;;  %v884_v57 = vadd.f32 %v1329_v34, %v796_v50  ;;  %v795_v58 = vmul.f32 %v1321_v30, %v474_v54  ;;  %v797_v59 = vmul.f32 %v1321_v30, %v563_v55 }
  0xe8   :  { %1056 = vst [vmem:[%s1661_s4 + $0x1b0] sm:$0xff] %v992_v48  ;;  %v991_v60 = vmax.f32 %v927_v52, 0.0  ;;  %v993_v61 = vmax.f32 %v929_v53, 0.0  ;;  %v478_v62 = vpop.f32.mrf.mxu0  ;;  %v567_v63 = vpop.f32.mrf.mxu1 }
  0xe9   :  { %v946_v0 = vmax.f32 %v882_v56, 0.0  ;;  %v948_v1 = vmax.f32 %v884_v57, 0.0  ;;  %v883_v2 = vadd.f32 %v1329_v34, %v795_v58  ;;  %v885_v3 = vadd.f32 %v1329_v34, %v797_v59 }
  0xea   :  { %1055 = vst [vmem:[%s1661_s4 + $0x1a8] sm:$0xff] %v991_v60  ;;  %1057 = vst [vmem:[%s1661_s4 + $0x1b8] sm:$0xff] %v993_v61  ;;  %v810_v5 = vmul.f32 %v1325_v32, %v478_v62  ;;  %v812_v6 = vmul.f32 %v1325_v32, %v567_v63  ;;  %v480_v7 = vpop.f32.mrf.mxu0  ;;  %v569_v8 = vpop.f32.mrf.mxu1 }
  0xeb   :  { %1010 = vst [vmem:[%s1661_s4 + $0x40] sm:$0xff] %v946_v0  ;;  %1012 = vst [vmem:[%s1661_s4 + $0x50] sm:$0xff] %v948_v1  ;;  %v947_v9 = vmax.f32 %v883_v2, 0.0  ;;  %v949_v10 = vmax.f32 %v885_v3, 0.0  ;;  %v811_v11 = vmul.f32 %v1325_v32, %v480_v7  ;;  %v813_v12 = vmul.f32 %v1325_v32, %v569_v8 }
  0xec   :  { %v898_v13 = vadd.f32 %v1339_v51, %v810_v5  ;;  %v900_v14 = vadd.f32 %v1339_v51, %v812_v6  ;;  %v484_v15 = vpop.f32.mrf.mxu0  ;;  %v573_v16 = vpop.f32.mrf.mxu1 }
  0xed   :  { %1011 = vst [vmem:[%s1661_s4 + $0x48] sm:$0xff] %v947_v9  ;;  %1013 = vst [vmem:[%s1661_s4 + $0x58] sm:$0xff] %v949_v10  ;;  %v899_v17 = vadd.f32 %v1339_v51, %v811_v11  ;;  %v901_v18 = vadd.f32 %v1339_v51, %v813_v12  ;;  %v826_v19 = vmul.f32 %v1323_v31, %v484_v15 }
  0xee   :  { %v828_v20 = vmul.f32 %v1323_v31, %v573_v16  ;;  %v962_v22 = vmax.f32 %v898_v13, 0.0  ;;  %v964_v23 = vmax.f32 %v900_v14, 0.0  ;;  %v486_v24 = vpop.f32.mrf.mxu0  ;;  %v575_v25 = vpop.f32.mrf.mxu1 }
  0xef   :  { %v963_v26 = vmax.f32 %v899_v17, 0.0  ;;  %v965_v27 = vmax.f32 %v901_v18, 0.0  ;;  %v914_v28 = vadd.f32 %v1363_v4, %v826_v19  ;;  %v827_v35 = vmul.f32 %v1323_v31, %v486_v24 }
  0xf0   :  { %v916_v29 = vadd.f32 %v1363_v4, %v828_v20  ;;  %1026 = vst [vmem:[%s1661_s4 + $0xc0] sm:$0xff] %v962_v22  ;;  %1028 = vst [vmem:[%s1661_s4 + $0xd0] sm:$0xff] %v964_v23  ;;  %v829_v36 = vmul.f32 %v1323_v31, %v575_v25  ;;  %v490_v37 = vpop.f32.mrf.mxu0  ;;  %v579_v38 = vpop.f32.mrf.mxu1 }
  0xf1   :  { %1027 = vst [vmem:[%s1661_s4 + $0xc8] sm:$0xff] %v963_v26  ;;  %1029 = vst [vmem:[%s1661_s4 + $0xd8] sm:$0xff] %v965_v27  ;;  %v978_v39 = vmax.f32 %v914_v28, 0.0  ;;  %v842_v41 = vmul.f32 %v1327_v33, %v490_v37  ;;  %v844_v42 = vmul.f32 %v1327_v33, %v579_v38  ;;  %v915_v43 = vadd.f32 %v1363_v4, %v827_v35 }
  0xf2   :  { %v980_v40 = vmax.f32 %v916_v29, 0.0  ;;  %v917_v44 = vadd.f32 %v1363_v4, %v829_v36  ;;  %v492_v45 = vpop.f32.mrf.mxu0  ;;  %v581_v46 = vpop.f32.mrf.mxu1 }
  0xf3   :  { %1042 = vst [vmem:[%s1661_s4 + $0x140] sm:$0xff] %v978_v39  ;;  %v930_v47 = vadd.f32 %v1385_v21, %v842_v41  ;;  %v932_v48 = vadd.f32 %v1385_v21, %v844_v42  ;;  %v843_v49 = vmul.f32 %v1327_v33, %v492_v45  ;;  %v845_v50 = vmul.f32 %v1327_v33, %v581_v46 }
  0xf4   :  { %1044 = vst [vmem:[%s1661_s4 + $0x150] sm:$0xff] %v980_v40  ;;  %v979_v52 = vmax.f32 %v915_v43, 0.0  ;;  %v981_v53 = vmax.f32 %v917_v44, 0.0  ;;  %v650_v54 = vpop.f32.mrf.mxu0  ;;  %v739_v55 = vpop.f32.mrf.mxu1 }
  0xf5   :  { %v994_v56 = vmax.f32 %v930_v47, 0.0  ;;  %v996_v57 = vmax.f32 %v932_v48, 0.0  ;;  %v931_v58 = vadd.f32 %v1385_v21, %v843_v49  ;;  %v933_v59 = vadd.f32 %v1385_v21, %v845_v50 }
  0xf6   :  { %1043 = vst [vmem:[%s1661_s4 + $0x148] sm:$0xff] %v979_v52  ;;  %1045 = vst [vmem:[%s1661_s4 + $0x158] sm:$0xff] %v981_v53  ;;  %v798_v60 = vmul.f32 %v1321_v30, %v650_v54  ;;  %v800_v61 = vmul.f32 %v1321_v30, %v739_v55  ;;  %v652_v62 = vpop.f32.mrf.mxu0  ;;  %v741_v63 = vpop.f32.mrf.mxu1 }
  0xf7   :  { %1058 = vst [vmem:[%s1661_s4 + $0x1c0] sm:$0xff] %v994_v56  ;;  %1060 = vst [vmem:[%s1661_s4 + $0x1d0] sm:$0xff] %v996_v57  ;;  %v995_v0 = vmax.f32 %v931_v58, 0.0  ;;  %v997_v1 = vmax.f32 %v933_v59, 0.0  ;;  %v799_v2 = vmul.f32 %v1321_v30, %v652_v62  ;;  %v801_v3 = vmul.f32 %v1321_v30, %v741_v63 }
  0xf8   :  { %v886_v5 = vadd.f32 %v1329_v34, %v798_v60  ;;  %v888_v6 = vadd.f32 %v1329_v34, %v800_v61  ;;  %v656_v7 = vpop.f32.mrf.mxu0  ;;  %v745_v8 = vpop.f32.mrf.mxu1 }
  0xf9   :  { %1059 = vst [vmem:[%s1661_s4 + $0x1c8] sm:$0xff] %v995_v0  ;;  %1061 = vst [vmem:[%s1661_s4 + $0x1d8] sm:$0xff] %v997_v1  ;;  %v887_v9 = vadd.f32 %v1329_v34, %v799_v2  ;;  %v889_v10 = vadd.f32 %v1329_v34, %v801_v3  ;;  %v814_v30 = vmul.f32 %v1325_v32, %v656_v7 }
  0xfa   :  { %v816_v11 = vmul.f32 %v1325_v32, %v745_v8  ;;  %v950_v12 = vmax.f32 %v886_v5, 0.0  ;;  %v952_v13 = vmax.f32 %v888_v6, 0.0  ;;  %v658_v14 = vpop.f32.mrf.mxu0  ;;  %v747_v15 = vpop.f32.mrf.mxu1 }
  0xfb   :  { %v951_v16 = vmax.f32 %v887_v9, 0.0  ;;  %v953_v17 = vmax.f32 %v889_v10, 0.0  ;;  %v902_v18 = vadd.f32 %v1339_v51, %v814_v30  ;;  %v815_v34 = vmul.f32 %v1325_v32, %v658_v14 }
  0xfc   :  { %v904_v19 = vadd.f32 %v1339_v51, %v816_v11  ;;  %1014 = vst [vmem:[%s1661_s4 + $0x60] sm:$0xff] %v950_v12  ;;  %1016 = vst [vmem:[%s1661_s4 + $0x70] sm:$0xff] %v952_v13  ;;  %v817_v20 = vmul.f32 %v1325_v32, %v747_v15  ;;  %v662_v22 = vpop.f32.mrf.mxu0  ;;  %v751_v23 = vpop.f32.mrf.mxu1 }
  0xfd   :  { %1015 = vst [vmem:[%s1661_s4 + $0x68] sm:$0xff] %v951_v16  ;;  %1017 = vst [vmem:[%s1661_s4 + $0x78] sm:$0xff] %v953_v17  ;;  %v966_v24 = vmax.f32 %v902_v18, 0.0  ;;  %v830_v26 = vmul.f32 %v1323_v31, %v662_v22  ;;  %v832_v27 = vmul.f32 %v1323_v31, %v751_v23  ;;  %v903_v28 = vadd.f32 %v1339_v51, %v815_v34 }
  0xfe   :  { %v968_v25 = vmax.f32 %v904_v19, 0.0  ;;  %v905_v32 = vadd.f32 %v1339_v51, %v817_v20  ;;  %v664_v29 = vpop.f32.mrf.mxu0  ;;  %v753_v35 = vpop.f32.mrf.mxu1 }
  0xff   :  { %1030 = vst [vmem:[%s1661_s4 + $0xe0] sm:$0xff] %v966_v24  ;;  %v918_v36 = vadd.f32 %v1363_v4, %v830_v26  ;;  %v920_v37 = vadd.f32 %v1363_v4, %v832_v27  ;;  %v831_v38 = vmul.f32 %v1323_v31, %v664_v29  ;;  %v833_v39 = vmul.f32 %v1323_v31, %v753_v35 }
 0x100   :  { %1032 = vst [vmem:[%s1661_s4 + $0xf0] sm:$0xff] %v968_v25  ;;  %v967_v40 = vmax.f32 %v903_v28, 0.0  ;;  %v969_v51 = vmax.f32 %v905_v32, 0.0  ;;  %v668_v41 = vpop.f32.mrf.mxu0  ;;  %v757_v42 = vpop.f32.mrf.mxu1 }
 0x101   :  { %v982_v43 = vmax.f32 %v918_v36, 0.0  ;;  %v984_v44 = vmax.f32 %v920_v37, 0.0  ;;  %v919_v45 = vadd.f32 %v1363_v4, %v831_v38  ;;  %v921_v46 = vadd.f32 %v1363_v4, %v833_v39 }
 0x102   :  { %1031 = vst [vmem:[%s1661_s4 + $0xe8] sm:$0xff] %v967_v40  ;;  %1033 = vst [vmem:[%s1661_s4 + $0xf8] sm:$0xff] %v969_v51  ;;  %v846_v31 = vmul.f32 %v1327_v33, %v668_v41  ;;  %v848_v47 = vmul.f32 %v1327_v33, %v757_v42  ;;  %v670_v48 = vpop.f32.mrf.mxu0  ;;  %v759_v49 = vpop.f32.mrf.mxu1 }
 0x103   :  { %1046 = vst [vmem:[%s1661_s4 + $0x160] sm:$0xff] %v982_v43  ;;  %1048 = vst [vmem:[%s1661_s4 + $0x170] sm:$0xff] %v984_v44  ;;  %v983_v4 = vmax.f32 %v919_v45, 0.0  ;;  %v985_v50 = vmax.f32 %v921_v46, 0.0  ;;  %v847_v52 = vmul.f32 %v1327_v33, %v670_v48  ;;  %v849_v53 = vmul.f32 %v1327_v33, %v759_v49 }
 0x104   :  { %v934_v54 = vadd.f32 %v1385_v21, %v846_v31  ;;  %v936_v55 = vadd.f32 %v1385_v21, %v848_v47 }
 0x105   :  { %1047 = vst [vmem:[%s1661_s4 + $0x168] sm:$0xff] %v983_v4  ;;  %1049 = vst [vmem:[%s1661_s4 + $0x178] sm:$0xff] %v985_v50  ;;  %v935_v56 = vadd.f32 %v1385_v21, %v847_v52  ;;  %v937_v57 = vadd.f32 %v1385_v21, %v849_v53 }
 0x106   :  { %v998_v58 = vmax.f32 %v934_v54, 0.0  ;;  %v1000_v59 = vmax.f32 %v936_v55, 0.0 }
 0x107   :  { %v999_v60 = vmax.f32 %v935_v56, 0.0  ;;  %v1001_v33 = vmax.f32 %v937_v57, 0.0 }
 0x108   :  { %1062 = vst [vmem:[%s1661_s4 + $0x1e0] sm:$0xff] %v998_v58  ;;  %1064 = vst [vmem:[%s1661_s4 + $0x1f0] sm:$0xff] %v1000_v59 }
 0x109   :  { %1063 = vst [vmem:[%s1661_s4 + $0x1e8] sm:$0xff] %v999_v60  ;;  %1065 = vst [vmem:[%s1661_s4 + $0x1f8] sm:$0xff] %v1001_v33 }

</bundles_post_ra>
